<compile_context>
chip_gen: v6e
topology: v6e:2x2x1
jax: 0.10.0
libtpu: 0.0.40
codegen_flags: <defaults>
</compile_context>

<pallas_src>
import functools

import jax
import jax.numpy as jnp
from jax.experimental import pallas as pl
from jax.experimental.pallas import tpu as pltpu

LN_EPS = 1e-5  # nn.LayerNorm default


def _round_up(x, m):
    return ((x + m - 1) // m) * m


# ----------------------------------------------------------------------------
# Kernel
# ----------------------------------------------------------------------------
def critic_kernel(x_ref, w1_ref, w2_ref, vecs_ref, out_ref, *, n_real):
    """One batch tile: [TB, K_pad] x weights -> lane-dense [1, TB] scores.

    Padded hidden columns are exactly zero by construction (zero-padded
    weights / biases / gamma / beta), so no lane mask is needed anywhere.
    """
    inv_n = 1.0 / float(n_real)

    v = vecs_ref[...]                       # [8, HP] f32 packed vectors
    b1, g1, bt1 = v[0:1, :], v[1:2, :], v[2:3, :]
    b2, g2, bt2 = v[3:4, :], v[4:5, :], v[5:6, :]
    w3_row = v[6:7, :]                      # [1, HP] output weights (f32)
    b3 = v[7:8, 0:1]                        # [1, 1]  output bias

    def layernorm(x, gamma, beta):
        # Pad columns of x are exactly zero -> sums over the full lane width
        # are the correct sums over the n_real genuine features.
        mean = jnp.sum(x, axis=-1, keepdims=True) * inv_n
        var = jnp.sum(x * x, axis=-1, keepdims=True) * inv_n - mean * mean
        var = jnp.maximum(var, 0.0)         # guard one-pass cancellation
        # gamma/beta are zero-padded, so pad columns come out exactly zero.
        return (x - mean) * jax.lax.rsqrt(var + LN_EPS) * gamma + beta

    # Layer 1 (embedding + concat folded on the host): single MXU dot.
    h = jnp.dot(x_ref[...], w1_ref[...],
                preferred_element_type=jnp.float32) + b1
    h = jnp.maximum(layernorm(h, g1, bt1), 0.0)

    # Layer 2
    h = jnp.dot(h.astype(w2_ref.dtype), w2_ref[...],
                preferred_element_type=jnp.float32) + b2
    h = jnp.maximum(layernorm(h, g2, bt2), 0.0)

    # Output layer, produced directly lane-dense as (1, TB):
    #   (1, HP) @ (HP, TB)  -- h.T is a cheap XLU transpose (idle unit here),
    # avoiding the N=1 matmul / masked [TB,1] store of the previous version.
    out_ref[...] = jnp.dot(w3_row, h.T,
                           preferred_element_type=jnp.float32) + b3


# ----------------------------------------------------------------------------
# Host-side weight preparation (done once per parameter set)
# ----------------------------------------------------------------------------
def prepare_params(p, N, *, use_bf16=True):
    """Fold embedding into layer 1, stack layer-1 weights, transpose to
    [in, out], pad hidden to a multiple of 128 and K to a multiple of 64,
    and pack all per-feature vectors into one [8, HP] array."""
    two_n = 2 * N
    hidden = p["w1"].shape[0]
    R = p["we"].shape[1]
    hp = _round_up(hidden, 128)
    k_real = two_n + R
    k_pad = _round_up(k_real, 64)

    w1 = p["w1"]                                  # [H, 2N + E]
    w1_sig = w1[:, :two_n]                        # [H, 2N]
    w1_emb = w1[:, two_n:]                        # [H, E]
    wi = w1_emb @ p["we"]                         # [H, R]  (embedding folded)
    b1 = p["b1"] + p["be"] @ w1_emb.T             # [1, H]

    def pad_cols(x):
        return jnp.pad(x, ((0, 0), (0, hp - x.shape[-1])))

    # Single stacked layer-1 weight: [K_pad, HP]  (rows = [signal | one-hot]).
    w1_full = jnp.concatenate([w1_sig.T, wi.T], axis=0)          # [2N+R, H]
    w1_full = jnp.pad(w1_full, ((0, k_pad - k_real), (0, hp - hidden)))
    w2_t = jnp.pad(p["w2"].T, ((0, hp - hidden), (0, hp - hidden)))  # [HP, HP]

    # Pack b1,g1,bt1,b2,g2,bt2,w3,b3 into one [8, HP] f32 array.
    vecs = jnp.concatenate([
        pad_cols(b1),
        pad_cols(p["g1"]), pad_cols(p["bt1"]),
        pad_cols(p["b2"]),
        pad_cols(p["g2"]), pad_cols(p["bt2"]),
        pad_cols(p["w3"]),                        # [1, H] output weights
        jnp.broadcast_to(p["b3"], (1, hp)),       # output bias (row 7)
    ], axis=0).astype(jnp.float32)                # [8, HP]

    mxu_dtype = jnp.bfloat16 if use_bf16 else jnp.float32
    return {
        "w1": w1_full.astype(mxu_dtype),
        "w2": w2_t.astype(mxu_dtype),
        "vecs": vecs,                             # f32 (v5e VPU has no bf16)
        "hidden": hidden,
        "hp": hp,
        "k_real": k_real,
        "k_pad": k_pad,
        "mxu_dtype": mxu_dtype,
    }


# ----------------------------------------------------------------------------
# Wrapper
# ----------------------------------------------------------------------------
def critic_forward(signal, i_onehot, prep, *, tile_b=None):
    """signal: [B, 2N] f32, i_onehot: [B, R] f32  ->  [B, 1] f32.

    tile_b=None -> grid=1 (best for single-TC v5e/v6e);
    tile_b=B//2 -> grid=2 "parallel" (one step per TensorCore on v7x).
    """
    B = signal.shape[0]
    k_real, k_pad = prep["k_real"], prep["k_pad"]
    hp = prep["hp"]
    mxu_dtype = prep["mxu_dtype"]

    tb = B if tile_b is None else max(8, min(tile_b, B))
    b_pad = _round_up(B, tb)
    num_tiles = b_pad // tb

    # Host-side concat + zero pad: one lane-dense [B_pad, K_pad] input.
    x = jnp.concatenate([signal, i_onehot], axis=1)
    x = jnp.pad(x, ((0, b_pad - B), (0, k_pad - k_real))).astype(mxu_dtype)

    wbytes = 2 if mxu_dtype == jnp.bfloat16 else 4
    cost = pl.CostEstimate(
        flops=2 * b_pad * (k_pad * hp + hp * hp + hp),
        transcendentals=2 * b_pad,
        bytes_accessed=(b_pad * k_pad * wbytes + b_pad * 4
                        + (k_pad * hp + hp * hp) * wbytes + 8 * hp * 4),
    )

    kernel = functools.partial(critic_kernel, n_real=prep["hidden"])

    out2d = pl.pallas_call(
        kernel,
        out_shape=jax.ShapeDtypeStruct((1, b_pad), jnp.float32),
        grid=(num_tiles,),
        in_specs=[
            pl.BlockSpec((tb, k_pad), lambda b: (b, 0)),    # batch tile
            pl.BlockSpec((k_pad, hp), lambda b: (0, 0)),    # w1 (resident)
            pl.BlockSpec((hp, hp), lambda b: (0, 0)),       # w2 (resident)
            pl.BlockSpec((8, hp), lambda b: (0, 0)),        # packed vectors
        ],
        out_specs=pl.BlockSpec((1, tb), lambda b: (0, b)),  # lane-dense slab
        compiler_params=pltpu.CompilerParams(
            dimension_semantics=("parallel",)),
        cost_estimate=cost,
    )(x, prep["w1"], prep["w2"], prep["vecs"])

    return out2d[0, :B][:, None]


# ----------------------------------------------------------------------------
# Synthetic parameters + pure-JAX reference (PyTorch semantics)
# ----------------------------------------------------------------------------
def init_params(key, N, num_receive_antennas, embed_dim=4, hidden_dim=100):
    in_dim = 2 * N + embed_dim
    ks = jax.random.split(key, 4)

    def lin(k, out_f, in_f):
        kw, kb = jax.random.split(k)
        bound = 1.0 / jnp.sqrt(in_f)
        w = jax.random.uniform(kw, (out_f, in_f), jnp.float32, -bound, bound)
        b = jax.random.uniform(kb, (1, out_f), jnp.float32, -bound, bound)
        return w, b

    we, be = lin(ks[0], embed_dim, num_receive_antennas)
    w1, b1 = lin(ks[1], hidden_dim, in_dim)
    w2, b2 = lin(ks[2], hidden_dim, hidden_dim)
    w3, b3 = lin(ks[3], 1, hidden_dim)
    return {
        "we": we, "be": be,
        "w1": w1, "b1": b1,
        "g1": jnp.ones((1, hidden_dim), jnp.float32),
        "bt1": jnp.zeros((1, hidden_dim), jnp.float32),
        "w2": w2, "b2": b2,
        "g2": jnp.ones((1, hidden_dim), jnp.float32),
        "bt2": jnp.zeros((1, hidden_dim), jnp.float32),
        "w3": w3, "b3": b3,
    }


def _layernorm_ref(x, gamma, beta):
    mean = jnp.mean(x, axis=-1, keepdims=True)
    var = jnp.mean((x - mean) ** 2, axis=-1, keepdims=True)   # biased, PyTorch
    return (x - mean) * jax.lax.rsqrt(var + LN_EPS) * gamma + beta


def critic_reference(signal, i, p):
    emb = i @ p["we"].T + p["be"]
    x = jnp.concatenate([signal, emb], axis=1)
    h = x @ p["w1"].T + p["b1"]
    h = jnp.maximum(_layernorm_ref(h, p["g1"], p["bt1"]), 0.0)
    h = h @ p["w2"].T + p["b2"]
    h = jnp.maximum(_layernorm_ref(h, p["g2"], p["bt2"]), 0.0)
    return h @ p["w3"].T + p["b3"]


# ----------------------------------------------------------------------------
if __name__ == "__main__":
    N = 16                      # 2N = 32 signal features
    num_receive_antennas = 4
    embed_dim = 4
    hidden_dim = 100
    B = 256

    key = jax.random.PRNGKey(0)
    k_sig, k_idx, k_par = jax.random.split(key, 3)

    signal = jax.random.normal(k_sig, (B, 2 * N), jnp.float32)
    idx = jax.random.randint(k_idx, (B,), 0, num_receive_antennas)
    i_onehot = jax.nn.one_hot(idx, num_receive_antennas, dtype=jnp.float32)

    params = init_params(k_par, N, num_receive_antennas, embed_dim, hidden_dim)
    ref = critic_reference(signal, i_onehot, params)

    # f32 MXU path, grid=1 (v5e/v6e-style launch): tight numerical check.
    prep_f32 = prepare_params(params, N, use_bf16=False)
    out_f32 = critic_forward(signal, i_onehot, prep_f32, tile_b=None)
    jax.block_until_ready(out_f32)
    assert out_f32.shape == (B, 1)
    assert jnp.allclose(out_f32, ref, atol=1e-4, rtol=1e-4)

    # bf16 MXU path, grid=2 "parallel" (v7x dual-TC style launch).
    prep_bf16 = prepare_params(params, N, use_bf16=True)
    out_bf16 = critic_forward(signal, i_onehot, prep_bf16, tile_b=B // 2)
    jax.block_until_ready(out_bf16)
    assert out_bf16.shape == (B, 1)
    assert jnp.allclose(out_bf16, ref, atol=5e-2, rtol=5e-2)

    print("KERNEL_OK")
</pallas_src>

<mosaic_0001>
module attributes {stable_mosaic.version = 11 : i64} {
  func.func @critic_kernel(%arg0: i32, %arg1: memref<256x64xf32, #tpu.memory_space<vmem>>, %arg2: memref<64x128xf32, #tpu.memory_space<vmem>>, %arg3: memref<128x128xf32, #tpu.memory_space<vmem>>, %arg4: memref<8x128xf32, #tpu.memory_space<vmem>>, %arg5: memref<1x256xf32, #tpu.memory_space<vmem>>) attributes {dimension_semantics = [#tpu.dimension_semantics<parallel>], iteration_bounds = array<i64: 1>, scalar_prefetch = 0 : i64, scratch_operands = 0 : i64, tpu.core_type = #tpu.core_type<tc>, window_params = [{transform_indices = @transform_0, window_bounds = array<i64: 256, 64>}, {pipeline_mode = #tpu.pipeline_mode<synchronous>, transform_indices = @transform_1, window_bounds = array<i64: 64, 128>}, {pipeline_mode = #tpu.pipeline_mode<synchronous>, transform_indices = @transform_2, window_bounds = array<i64: 128, 128>}, {pipeline_mode = #tpu.pipeline_mode<synchronous>, transform_indices = @transform_3, window_bounds = array<i64: 8, 128>}, {transform_indices = @transform_4, window_bounds = array<i64: 1, 256>}]} {
    %c0 = arith.constant 0 : index
    %c0_0 = arith.constant 0 : index
    %0 = vector.load %arg4[%c0, %c0_0] : memref<8x128xf32, #tpu.memory_space<vmem>>, vector<8x128xf32>
    %1 = vector.extract_strided_slice %0 {offsets = [0, 0], sizes = [1, 128], strides = [1, 1]} : vector<8x128xf32> to vector<1x128xf32>
    %2 = vector.extract_strided_slice %0 {offsets = [1, 0], sizes = [1, 128], strides = [1, 1]} : vector<8x128xf32> to vector<1x128xf32>
    %3 = vector.extract_strided_slice %0 {offsets = [2, 0], sizes = [1, 128], strides = [1, 1]} : vector<8x128xf32> to vector<1x128xf32>
    %4 = vector.extract_strided_slice %0 {offsets = [3, 0], sizes = [1, 128], strides = [1, 1]} : vector<8x128xf32> to vector<1x128xf32>
    %5 = vector.extract_strided_slice %0 {offsets = [4, 0], sizes = [1, 128], strides = [1, 1]} : vector<8x128xf32> to vector<1x128xf32>
    %6 = vector.extract_strided_slice %0 {offsets = [5, 0], sizes = [1, 128], strides = [1, 1]} : vector<8x128xf32> to vector<1x128xf32>
    %7 = vector.extract_strided_slice %0 {offsets = [6, 0], sizes = [1, 128], strides = [1, 1]} : vector<8x128xf32> to vector<1x128xf32>
    %8 = vector.extract_strided_slice %0 {offsets = [7, 0], sizes = [1, 1], strides = [1, 1]} : vector<8x128xf32> to vector<1x1xf32>
    %c0_1 = arith.constant 0 : index
    %c0_2 = arith.constant 0 : index
    %9 = vector.load %arg1[%c0_1, %c0_2] : memref<256x64xf32, #tpu.memory_space<vmem>>, vector<256x64xf32>
    %c0_3 = arith.constant 0 : index
    %c0_4 = arith.constant 0 : index
    %10 = vector.load %arg2[%c0_3, %c0_4] : memref<64x128xf32, #tpu.memory_space<vmem>>, vector<64x128xf32>
    %cst = arith.constant dense<0.000000e+00> : vector<256x128xf32>
    %11 = tpu.matmul %9, %10, %cst {dimension_numbers = #tpu.dot_dimension_numbers<[1], [0], [0], [1], [0, 0, 1, 1], [], []>} : vector<256x64xf32>, vector<64x128xf32>, vector<256x128xf32> -> vector<256x128xf32>
    %12 = vector.broadcast %1 : vector<1x128xf32> to vector<256x128xf32>
    %13 = arith.addf %11, %12 : vector<256x128xf32>
    %cst_5 = arith.constant dense<0.000000e+00> : vector<256xf32>
    %14 = vector.multi_reduction <add>, %13, %cst_5 [1] : vector<256x128xf32> to vector<256xf32>
    %15 = vector.shape_cast %14 : vector<256xf32> to vector<256x1xf32>
    %cst_6 = arith.constant 0.00999999977 : f32
    %16 = vector.broadcast %cst_6 : f32 to vector<256x1xf32>
    %17 = arith.mulf %15, %16 : vector<256x1xf32>
    %18 = arith.mulf %13, %13 : vector<256x128xf32>
    %cst_7 = arith.constant dense<0.000000e+00> : vector<256xf32>
    %19 = vector.multi_reduction <add>, %18, %cst_7 [1] : vector<256x128xf32> to vector<256xf32>
    %20 = vector.shape_cast %19 : vector<256xf32> to vector<256x1xf32>
    %cst_8 = arith.constant 0.00999999977 : f32
    %21 = vector.broadcast %cst_8 : f32 to vector<256x1xf32>
    %22 = arith.mulf %20, %21 : vector<256x1xf32>
    %23 = arith.mulf %17, %17 : vector<256x1xf32>
    %24 = arith.subf %22, %23 : vector<256x1xf32>
    %cst_9 = arith.constant 0.000000e+00 : f32
    %25 = vector.broadcast %cst_9 : f32 to vector<256x1xf32>
    %26 = arith.maximumf %24, %25 : vector<256x1xf32>
    %27 = vector.broadcast %17 : vector<256x1xf32> to vector<256x128xf32>
    %28 = arith.subf %13, %27 : vector<256x128xf32>
    %cst_10 = arith.constant 9.99999974E-6 : f32
    %29 = vector.broadcast %cst_10 : f32 to vector<256x1xf32>
    %30 = arith.addf %26, %29 : vector<256x1xf32>
    %31 = math.rsqrt %30 : vector<256x1xf32>
    %32 = vector.broadcast %31 : vector<256x1xf32> to vector<256x128xf32>
    %33 = arith.mulf %28, %32 : vector<256x128xf32>
    %34 = vector.broadcast %2 : vector<1x128xf32> to vector<256x128xf32>
    %35 = arith.mulf %33, %34 : vector<256x128xf32>
    %36 = vector.broadcast %3 : vector<1x128xf32> to vector<256x128xf32>
    %37 = arith.addf %35, %36 : vector<256x128xf32>
    %cst_11 = arith.constant 0.000000e+00 : f32
    %38 = vector.broadcast %cst_11 : f32 to vector<256x128xf32>
    %39 = arith.maximumf %37, %38 : vector<256x128xf32>
    %c0_12 = arith.constant 0 : index
    %c0_13 = arith.constant 0 : index
    %40 = vector.load %arg3[%c0_12, %c0_13] : memref<128x128xf32, #tpu.memory_space<vmem>>, vector<128x128xf32>
    %cst_14 = arith.constant dense<0.000000e+00> : vector<256x128xf32>
    %41 = tpu.matmul %39, %40, %cst_14 {dimension_numbers = #tpu.dot_dimension_numbers<[1], [0], [0], [1], [0, 0, 1, 1], [], []>} : vector<256x128xf32>, vector<128x128xf32>, vector<256x128xf32> -> vector<256x128xf32>
    %42 = vector.broadcast %4 : vector<1x128xf32> to vector<256x128xf32>
    %43 = arith.addf %41, %42 : vector<256x128xf32>
    %cst_15 = arith.constant dense<0.000000e+00> : vector<256xf32>
    %44 = vector.multi_reduction <add>, %43, %cst_15 [1] : vector<256x128xf32> to vector<256xf32>
    %45 = vector.shape_cast %44 : vector<256xf32> to vector<256x1xf32>
    %cst_16 = arith.constant 0.00999999977 : f32
    %46 = vector.broadcast %cst_16 : f32 to vector<256x1xf32>
    %47 = arith.mulf %45, %46 : vector<256x1xf32>
    %48 = arith.mulf %43, %43 : vector<256x128xf32>
    %cst_17 = arith.constant dense<0.000000e+00> : vector<256xf32>
    %49 = vector.multi_reduction <add>, %48, %cst_17 [1] : vector<256x128xf32> to vector<256xf32>
    %50 = vector.shape_cast %49 : vector<256xf32> to vector<256x1xf32>
    %cst_18 = arith.constant 0.00999999977 : f32
    %51 = vector.broadcast %cst_18 : f32 to vector<256x1xf32>
    %52 = arith.mulf %50, %51 : vector<256x1xf32>
    %53 = arith.mulf %47, %47 : vector<256x1xf32>
    %54 = arith.subf %52, %53 : vector<256x1xf32>
    %cst_19 = arith.constant 0.000000e+00 : f32
    %55 = vector.broadcast %cst_19 : f32 to vector<256x1xf32>
    %56 = arith.maximumf %54, %55 : vector<256x1xf32>
    %57 = vector.broadcast %47 : vector<256x1xf32> to vector<256x128xf32>
    %58 = arith.subf %43, %57 : vector<256x128xf32>
    %cst_20 = arith.constant 9.99999974E-6 : f32
    %59 = vector.broadcast %cst_20 : f32 to vector<256x1xf32>
    %60 = arith.addf %56, %59 : vector<256x1xf32>
    %61 = math.rsqrt %60 : vector<256x1xf32>
    %62 = vector.broadcast %61 : vector<256x1xf32> to vector<256x128xf32>
    %63 = arith.mulf %58, %62 : vector<256x128xf32>
    %64 = vector.broadcast %5 : vector<1x128xf32> to vector<256x128xf32>
    %65 = arith.mulf %63, %64 : vector<256x128xf32>
    %66 = vector.broadcast %6 : vector<1x128xf32> to vector<256x128xf32>
    %67 = arith.addf %65, %66 : vector<256x128xf32>
    %cst_21 = arith.constant 0.000000e+00 : f32
    %68 = vector.broadcast %cst_21 : f32 to vector<256x128xf32>
    %69 = arith.maximumf %67, %68 : vector<256x128xf32>
    %70 = tpu.transpose %69, [1, 0] : vector<256x128xf32> -> vector<128x256xf32>
    %cst_22 = arith.constant dense<0.000000e+00> : vector<1x256xf32>
    %71 = tpu.matmul %7, %70, %cst_22 {dimension_numbers = #tpu.dot_dimension_numbers<[1], [0], [0], [1], [0, 0, 1, 1], [], []>} : vector<1x128xf32>, vector<128x256xf32>, vector<1x256xf32> -> vector<1x256xf32>
    %72 = vector.broadcast %8 : vector<1x1xf32> to vector<1x256xf32>
    %73 = arith.addf %71, %72 : vector<1x256xf32>
    %c0_23 = arith.constant 0 : index
    %c0_24 = arith.constant 0 : index
    %74 = vector.load %arg5[%c0_23, %c0_24] : memref<1x256xf32, #tpu.memory_space<vmem>>, vector<1x256xf32>
    tpu.vector_store %arg5[%c0_23, %c0_24], %73 {strides = array<i32>} : memref<1x256xf32, #tpu.memory_space<vmem>>, vector<1x256xf32>,
    return
  }
  func.func @transform_0(%arg0: i32) -> (i32, i32) {
    %c0_i32 = arith.constant 0 : i32
    %c0_i32_0 = arith.constant 0 : i32
    return %arg0, %c0_i32 : i32, i32
  }
  func.func @transform_1(%arg0: i32) -> (i32, i32) {
    %c0_i32 = arith.constant 0 : i32
    %c0_i32_0 = arith.constant 0 : i32
    %c0_i32_1 = arith.constant 0 : i32
    return %c0_i32, %c0_i32_0 : i32, i32
  }
  func.func @transform_2(%arg0: i32) -> (i32, i32) {
    %c0_i32 = arith.constant 0 : i32
    %c0_i32_0 = arith.constant 0 : i32
    %c0_i32_1 = arith.constant 0 : i32
    return %c0_i32, %c0_i32_0 : i32, i32
  }
  func.func @transform_3(%arg0: i32) -> (i32, i32) {
    %c0_i32 = arith.constant 0 : i32
    %c0_i32_0 = arith.constant 0 : i32
    %c0_i32_1 = arith.constant 0 : i32
    return %c0_i32, %c0_i32_0 : i32, i32
  }
  func.func @transform_4(%arg0: i32) -> (i32, i32) {
    %c0_i32 = arith.constant 0 : i32
    %c0_i32_0 = arith.constant 0 : i32
    return %c0_i32, %arg0 : i32, i32
  }
}

</mosaic_0001>

<bundles_post_ra>
// kernel: tpu_custom_call.1
= control target key start
LH: loop header
LB: loop body
LE: loop exit
PB: predicated region body
PF: predicated region fallthrough
CT: control target
= control target key end

     0   :  { %vm63_vm0 = vcmask 523264   ;;  %s3577_s0 = inlined_call_operand.vmem [shape: f32[256,64], index: 0, kind: input, shape index: {}]   ;;  %s3578_s1 = inlined_call_operand.vmem [shape: f32[64,128], index: 1, kind: input, shape index: {}]   ;;  %s3579_s2 = inlined_call_operand.vmem [shape: f32[128,128], index: 2, kind: input, shape index: {}]   ;;  %s3580_s3 = inlined_call_operand.vmem [shape: f32[8,128], index: 3, kind: input, shape index: {}]   ;;  %s3581_s4 = inlined_call_operand.hbm [shape: f32[1,256], index: 4, kind: output, shape index: {}]  }
   0x1   :  { %v58_v0 = vld [vmem:[%s3578_s1 + $0x38] sm:$0xff]  ;;  %v57_v1 = vld [vmem:[%s3578_s1 + $0x30] sm:$0xff]  ;;  %v56_v2 = vld [vmem:[%s3578_s1 + $0x28] sm:$0xff] }
   0x2   :  { %2004 = vmatprep.subr.mxu0 %v58_v0  ;;  %v19_v3 = vld [vmem:[%s3577_s0] sm:$0xff]  ;;  %v54_v5 = vld [vmem:[%s3578_s1 + $0x18] sm:$0xff]  ;;  %v53_v6 = vld [vmem:[%s3578_s1 + $0x10] sm:$0xff] }
   0x3   :  { %2005 = vmatpush3.msra.mxu0 %v58_v0  ;;  %2020 = vmatprep.mubr.msk.f32.mxu0 %vm63_vm0, %v19_v3  ;;  %v55_v4 = vld [vmem:[%s3578_s1 + $0x20] sm:$0xff]  ;;  %v52_v7 = vld [vmem:[%s3578_s1 + $0x8] sm:$0xff] }
   0x4   :  { %2006 = vmatprep.subr.mxu0 %v57_v1  ;;  %v51_v8 = vld [vmem:[%s3578_s1] sm:$0xff] }
   0x5   :  { %2007 = vmatpush3.msra.mxu0 %v57_v1 }
   0x6   :  { %2008 = vmatprep.subr.mxu0 %v56_v2 }
   0x7   :  { %2009 = vmatpush3.msra.mxu0 %v56_v2 }
   0x8   :  { %2010 = vmatprep.subr.mxu0 %v55_v4 }
   0x9   :  { %2011 = vmatpush3.msra.mxu0 %v55_v4 }
   0xa   :  { %2012 = vmatprep.subr.mxu0 %v54_v5 }
   0xb   :  { %2013 = vmatpush3.msra.mxu0 %v54_v5 }
   0xc   :  { %2014 = vmatprep.subr.mxu0 %v53_v6 }
   0xd   :  { %2015 = vmatpush3.msra.mxu0 %v53_v6 }
   0xe   :  { %2016 = vmatprep.subr.mxu0 %v52_v7 }
   0xf   :  { %9 = vsyncpa [#allocation3], 0  ;;  %2017 = vmatpush3.msra.mxu0 %v52_v7  ;;  %v20_v9 = vld [vmem:[%s3577_s0 + $0x8] sm:$0xff]  ;;  %v21_v10 = vld [vmem:[%s3577_s0 + $0x10] sm:$0xff]  ;;  %v3582_v40 = vlaneseq }
  0x10   :  { %2018 = vmatprep.subr.mxu0 %v51_v8  ;;  %v22_v11 = vld [vmem:[%s3577_s0 + $0x18] sm:$0xff]  ;;  %v23_v12 = vld [vmem:[%s3577_s0 + $0x20] sm:$0xff]  ;;  %v24_v13 = vld [vmem:[%s3577_s0 + $0x28] sm:$0xff] }
  0x11   :  { %2019 = vmatpush3.msra.mxu0 %v51_v8  ;;  %v25_v14 = vld [vmem:[%s3577_s0 + $0x30] sm:$0xff]  ;;  %v26_v15 = vld [vmem:[%s3577_s0 + $0x38] sm:$0xff]  ;;  %v27_v16 = vld [vmem:[%s3577_s0 + $0x40] sm:$0xff]  ;;  %v2484_v41 = vshrl.u32 %v3582_v40, 7 }
  0x12   :  { %2021 = vmatmul.mubr.msk.f32.vlgmr.msra.gmra.mxu0 %vm63_vm0, %v20_v9  ;;  %v28_v17 = vld [vmem:[%s3577_s0 + $0x48] sm:$0xff]  ;;  %v29_v18 = vld [vmem:[%s3577_s0 + $0x50] sm:$0xff]  ;;  %v30_v19 = vld [vmem:[%s3577_s0 + $0x58] sm:$0xff] }
  0x13   :  { %2023 = vmatprep.mubr.msk.f32.mxu0 %vm63_vm0, %v21_v10  ;;  %v31_v20 = vld [vmem:[%s3577_s0 + $0x60] sm:$0xff]  ;;  %v32_v21 = vld [vmem:[%s3577_s0 + $0x68] sm:$0xff]  ;;  %v33_v22 = vld [vmem:[%s3577_s0 + $0x70] sm:$0xff]  ;;  %v61_v42 = vsub.s32 0, %v2484_v41 }
  0x14   :  { %v34_v23 = vld [vmem:[%s3577_s0 + $0x78] sm:$0xff]  ;;  %v35_v24 = vld [vmem:[%s3577_s0 + $0x80] sm:$0xff]  ;;  %v36_v25 = vld [vmem:[%s3577_s0 + $0x88] sm:$0xff] }
  0x15   :  { %v37_v26 = vld [vmem:[%s3577_s0 + $0x90] sm:$0xff]  ;;  %v38_v27 = vld [vmem:[%s3577_s0 + $0x98] sm:$0xff]  ;;  %v39_v28 = vld [vmem:[%s3577_s0 + $0xa0] sm:$0xff] }
  0x16   :  { %2024 = vmatmul.mubr.msk.f32.gmra.mxu0 %vm63_vm0, %v22_v11  ;;  %v40_v29 = vld [vmem:[%s3577_s0 + $0xa8] sm:$0xff]  ;;  %v41_v30 = vld [vmem:[%s3577_s0 + $0xb0] sm:$0xff]  ;;  %v42_v31 = vld [vmem:[%s3577_s0 + $0xb8] sm:$0xff] }
  0x17   :  { %2026 = vmatprep.mubr.msk.f32.mxu0 %vm63_vm0, %v23_v12  ;;  %v43_v32 = vld [vmem:[%s3577_s0 + $0xc0] sm:$0xff]  ;;  %v44_v33 = vld [vmem:[%s3577_s0 + $0xc8] sm:$0xff]  ;;  %v45_v34 = vld [vmem:[%s3577_s0 + $0xd0] sm:$0xff] }
  0x18   :  { %v46_v35 = vld [vmem:[%s3577_s0 + $0xd8] sm:$0xff]  ;;  %v47_v36 = vld [vmem:[%s3577_s0 + $0xe0] sm:$0xff]  ;;  %v48_v37 = vld [vmem:[%s3577_s0 + $0xe8] sm:$0xff] }
  0x19   :  { %v49_v38 = vld [vmem:[%s3577_s0 + $0xf0] sm:$0xff]  ;;  %v50_v39 = vld [vmem:[%s3577_s0 + $0xf8] sm:$0xff]  ;;  %v2490_v43 = vld [vmem:[%s3580_s3] sm:$0xff] }
  0x1a   :  { %2027 = vmatmul.mubr.msk.f32.gmra.mxu0 %vm63_vm0, %v24_v13  ;;  %v2493_v44 = vrot.slane %v2490_v43, %v61_v42  ;;  %v952_v61 = vld [vmem:[%s3579_s2 + $0x78] sm:$0xff]  ;;  %v951_v63 = vld [vmem:[%s3579_s2 + $0x70] sm:$0xff]  ;;  %v950_v2 = vld [vmem:[%s3579_s2 + $0x68] sm:$0xff] }
  0x1b   :  { %2029 = vmatprep.mubr.msk.f32.mxu0 %vm63_vm0, %v25_v14  ;;  %2068 = vmatprep.subr.mxu1 %v952_v61  ;;  %v949_v6 = vld [vmem:[%s3579_s2 + $0x60] sm:$0xff]  ;;  %v948_v7 = vld [vmem:[%s3579_s2 + $0x58] sm:$0xff]  ;;  %v947_v10 = vld [vmem:[%s3579_s2 + $0x50] sm:$0xff] }
  0x1c   :  { %2069 = vmatpush3.msra.mxu1 %v952_v61  ;;  %v946_v12 = vld [vmem:[%s3579_s2 + $0x48] sm:$0xff] }
  0x1d   :  { %2070 = vmatprep.subr.mxu1 %v951_v63 }
  0x1e   :  { %2030 = vmatmul.mubr.msk.f32.gmra.mxu0 %vm63_vm0, %v26_v15  ;;  %2071 = vmatpush3.msra.mxu1 %v951_v63 }
  0x1f   :  { %2032 = vmatprep.mubr.msk.f32.mxu0 %vm63_vm0, %v27_v16  ;;  %2072 = vmatprep.subr.mxu1 %v950_v2  ;;  %v945_v16 = vld [vmem:[%s3579_s2 + $0x40] sm:$0xff] }
  0x20   :  { %2073 = vmatpush3.msra.mxu1 %v950_v2 }
  0x21   :  { %2074 = vmatprep.subr.mxu1 %v949_v6 }
  0x22   :  { %2033 = vmatmul.mubr.msk.f32.gmra.mxu0 %vm63_vm0, %v28_v17  ;;  %2075 = vmatpush3.msra.mxu1 %v949_v6  ;;  %v944_v17 = vld [vmem:[%s3579_s2 + $0x38] sm:$0xff] }
  0x23   :  { %2035 = vmatprep.mubr.msk.f32.mxu0 %vm63_vm0, %v29_v18  ;;  %2076 = vmatprep.subr.mxu1 %v948_v7 }
  0x24   :  { %2077 = vmatpush3.msra.mxu1 %v948_v7 }
  0x25   :  { %2078 = vmatprep.subr.mxu1 %v947_v10 }
  0x26   :  { %2036 = vmatmul.mubr.msk.f32.gmra.mxu0 %vm63_vm0, %v30_v19  ;;  %2079 = vmatpush3.msra.mxu1 %v947_v10 }
  0x27   :  { %2038 = vmatprep.mubr.msk.f32.mxu0 %vm63_vm0, %v31_v20  ;;  %2080 = vmatprep.subr.mxu1 %v946_v12  ;;  %v943_v20 = vld [vmem:[%s3579_s2 + $0x30] sm:$0xff] }
  0x28   :  { %2081 = vmatpush3.msra.mxu1 %v946_v12 }
  0x29   :  { %2082 = vmatprep.subr.mxu1 %v945_v16 }
  0x2a   :  { %2039 = vmatmul.mubr.msk.f32.gmra.mxu0 %vm63_vm0, %v32_v21  ;;  %2083 = vmatpush3.msra.mxu1 %v945_v16 }
  0x2b   :  { %2041 = vmatprep.mubr.msk.f32.mxu0 %vm63_vm0, %v33_v22  ;;  %2084 = vmatprep.subr.mxu1 %v944_v17  ;;  %v942_v22 = vld [vmem:[%s3579_s2 + $0x28] sm:$0xff] }
  0x2c   :  { %2085 = vmatpush3.msra.mxu1 %v944_v17 }
  0x2d   :  { %2086 = vmatprep.subr.mxu1 %v943_v20 }
  0x2e   :  { %2042 = vmatmul.mubr.msk.f32.gmra.mxu0 %vm63_vm0, %v34_v23  ;;  %2087 = vmatpush3.msra.mxu1 %v943_v20 }
  0x2f   :  { %2044 = vmatprep.mubr.msk.f32.mxu0 %vm63_vm0, %v35_v24  ;;  %2088 = vmatprep.subr.mxu1 %v942_v22 }
  0x30   :  { %2089 = vmatpush3.msra.mxu1 %v942_v22 }
  0x32   :  { %2045 = vmatmul.mubr.msk.f32.gmra.mxu0 %vm63_vm0, %v36_v25 }
  0x33   :  { %2047 = vmatprep.mubr.msk.f32.mxu0 %vm63_vm0, %v37_v26  ;;  %v941_v26 = vld [vmem:[%s3579_s2 + $0x20] sm:$0xff] }
  0x34   :  { %2090 = vmatprep.subr.mxu1 %v941_v26 }
  0x35   :  { %2091 = vmatpush3.msra.mxu1 %v941_v26 }
  0x36   :  { %2048 = vmatmul.mubr.msk.f32.gmra.mxu0 %vm63_vm0, %v38_v27  ;;  %v940_v27 = vld [vmem:[%s3579_s2 + $0x18] sm:$0xff] }
  0x37   :  { %2050 = vmatprep.mubr.msk.f32.mxu0 %vm63_vm0, %v39_v28  ;;  %2092 = vmatprep.subr.mxu1 %v940_v27 }
  0x38   :  { %2093 = vmatpush3.msra.mxu1 %v940_v27 }
  0x3a   :  { %2051 = vmatmul.mubr.msk.f32.gmra.mxu0 %vm63_vm0, %v40_v29 }
  0x3b   :  { %2053 = vmatprep.mubr.msk.f32.mxu0 %vm63_vm0, %v41_v30  ;;  %v939_v30 = vld [vmem:[%s3579_s2 + $0x10] sm:$0xff] }
  0x3c   :  { %2094 = vmatprep.subr.mxu1 %v939_v30 }
  0x3d   :  { %2095 = vmatpush3.msra.mxu1 %v939_v30 }
  0x3e   :  { %2054 = vmatmul.mubr.msk.f32.gmra.mxu0 %vm63_vm0, %v42_v31 }
  0x3f   :  { %2056 = vmatprep.mubr.msk.f32.mxu0 %vm63_vm0, %v43_v32  ;;  %v938_v32 = vld [vmem:[%s3579_s2 + $0x8] sm:$0xff] }
  0x40   :  { %2096 = vmatprep.subr.mxu1 %v938_v32 }
  0x41   :  { %2097 = vmatpush3.msra.mxu1 %v938_v32 }
  0x42   :  { %2057 = vmatmul.mubr.msk.f32.gmra.mxu0 %vm63_vm0, %v44_v33 }
  0x43   :  { %2059 = vmatprep.mubr.msk.f32.mxu0 %vm63_vm0, %v45_v34 }
  0x46   :  { %2060 = vmatmul.mubr.msk.f32.gmra.mxu0 %vm63_vm0, %v46_v35 }
  0x47   :  { %2062 = vmatprep.mubr.msk.f32.mxu0 %vm63_vm0, %v47_v36  ;;  %v937_v36 = vld [vmem:[%s3579_s2] sm:$0xff] }
  0x48   :  { %2098 = vmatprep.subr.mxu1 %v937_v36 }
  0x49   :  { %2099 = vmatpush3.msra.mxu1 %v937_v36 }
  0x4a   :  { %2063 = vmatmul.mubr.msk.f32.gmra.mxu0 %vm63_vm0, %v48_v37 }
  0x4b   :  { %2065 = vmatprep.mubr.msk.f32.mxu0 %vm63_vm0, %v49_v38 }
  0x4e   :  { %2066 = vmatmul.mubr.msk.f32.gmra.mxu0 %vm63_vm0, %v50_v39 }
  0xd2   :  { %v2022_v45 = vpop.f32.mrf.mxu0 }
  0xd3   :  { %v2496_v46 = vadd.f32 %v2022_v45, %v2493_v44 }
  0xd4   :  { %v226_v47 = vpop.f32.mrf.mxu0 }
  0xd5   :  { %v2499_v48 = vadd.f32 %v226_v47, %v2493_v44  ;;  %387 = vadd.xlane.f32.xlu0 %v2496_v46  ;;  %v482_v49 = vmul.f32 %v2496_v46, %v2496_v46 }
  0xd6   :  { %v2025_v50 = vpop.f32.mrf.mxu0 }
  0xd7   :  { %515 = vadd.xlane.f32.xlu1 %v482_v49  ;;  %v481_v53 = vmul.f32 %v2499_v48, %v2499_v48  ;;  %v2511_v55 = vadd.f32 %v2025_v50, %v2493_v44 }
  0xd8   :  { %v236_v51 = vpop.f32.mrf.mxu0 }
  0xd9   :  { %v2505_v52 = vadd.f32 %v236_v51, %v2493_v44  ;;  %385 = vadd.xlane.f32.xlu0 %v2499_v48  ;;  %v484_v59 = vmul.f32 %v2511_v55, %v2511_v55 }
  0xda   :  { %v2028_v54 = vpop.f32.mrf.mxu0 }
  0xdb   :  { %513 = vadd.xlane.f32.xlu1 %v481_v53  ;;  %v483_v57 = vmul.f32 %v2505_v52, %v2505_v52  ;;  %v2526_v62 = vadd.f32 %v2028_v54, %v2493_v44 }
  0xdc   :  { %v246_v56 = vpop.f32.mrf.mxu0 }
  0xdd   :  { %389 = vadd.xlane.f32.xlu0 %v2505_v52  ;;  %v2518_v58 = vadd.f32 %v246_v56, %v2493_v44  ;;  %v486_v4 = vmul.f32 %v2526_v62, %v2526_v62 }
  0xde   :  { %v2031_v60 = vpop.f32.mrf.mxu0 }
  0xdf   :  { %391 = vadd.xlane.f32.xlu1 %v2511_v55  ;;  %v485_v1 = vmul.f32 %v2518_v58, %v2518_v58  ;;  %v2550_v8 = vadd.f32 %v2031_v60, %v2493_v44 }
  0xe0   :  { %v256_v0 = vpop.f32.mrf.mxu0 }
  0xe1   :  { %517 = vadd.xlane.f32.xlu0 %v483_v57  ;;  %v2539_v3 = vadd.f32 %v256_v0, %v2493_v44  ;;  %v488_v14 = vmul.f32 %v2550_v8, %v2550_v8 }
  0xe2   :  { %v2034_v5 = vpop.f32.mrf.mxu0 }
  0xe3   :  { %519 = vadd.xlane.f32.xlu1 %v484_v59  ;;  %v487_v11 = vmul.f32 %v2539_v3, %v2539_v3  ;;  %v2574_v18 = vadd.f32 %v2034_v5, %v2493_v44 }
  0xe4   :  { %v266_v9 = vpop.f32.mrf.mxu0 }
  0xe5   :  { %393 = vadd.xlane.f32.xlu0 %v2518_v58  ;;  %v2563_v13 = vadd.f32 %v266_v9, %v2493_v44  ;;  %v490_v24 = vmul.f32 %v2574_v18, %v2574_v18 }
  0xe6   :  { %v2037_v15 = vpop.f32.mrf.mxu0 }
  0xe7   :  { %395 = vadd.xlane.f32.xlu1 %v2526_v62  ;;  %v489_v21 = vmul.f32 %v2563_v13, %v2563_v13  ;;  %v2598_v28 = vadd.f32 %v2037_v15, %v2493_v44 }
  0xe8   :  { %v276_v19 = vpop.f32.mrf.mxu0 }
  0xe9   :  { %521 = vadd.xlane.f32.xlu0 %v485_v1  ;;  %v2587_v23 = vadd.f32 %v276_v19, %v2493_v44  ;;  %v492_v34 = vmul.f32 %v2598_v28, %v2598_v28 }
  0xea   :  { %v2040_v25 = vpop.f32.mrf.mxu0 }
  0xeb   :  { %523 = vadd.xlane.f32.xlu1 %v486_v4  ;;  %v491_v31 = vmul.f32 %v2587_v23, %v2587_v23  ;;  %v2619_v37 = vadd.f32 %v2040_v25, %v2493_v44 }
  0xec   :  { %v286_v29 = vpop.f32.mrf.mxu0 }
  0xed   :  { %397 = vadd.xlane.f32.xlu0 %v2539_v3  ;;  %v2611_v33 = vadd.f32 %v286_v29, %v2493_v44  ;;  %v494_v45 = vmul.f32 %v2619_v37, %v2619_v37 }
  0xee   :  { %v2043_v35 = vpop.f32.mrf.mxu0 }
  0xef   :  { %399 = vadd.xlane.f32.xlu1 %v2550_v8  ;;  %v493_v39 = vmul.f32 %v2611_v33, %v2611_v33  ;;  %v2631_v49 = vadd.f32 %v2043_v35, %v2493_v44 }
  0xf0   :  { %v296_v38 = vpop.f32.mrf.mxu0 }
  0xf1   :  { %525 = vadd.xlane.f32.xlu0 %v487_v11  ;;  %v2626_v42 = vadd.f32 %v296_v38, %v2493_v44  ;;  %v496_v54 = vmul.f32 %v2631_v49, %v2631_v49 }
  0xf2   :  { %v2046_v47 = vpop.f32.mrf.mxu0 }
  0xf3   :  { %527 = vadd.xlane.f32.xlu1 %v488_v14  ;;  %v495_v51 = vmul.f32 %v2626_v42, %v2626_v42  ;;  %v2643_v57 = vadd.f32 %v2046_v47, %v2493_v44 }
  0xf4   :  { %v306_v50 = vpop.f32.mrf.mxu0 }
  0xf5   :  { %401 = vadd.xlane.f32.xlu0 %v2563_v13  ;;  %v2638_v53 = vadd.f32 %v306_v50, %v2493_v44  ;;  %v498_v63 = vmul.f32 %v2643_v57, %v2643_v57 }
  0xf6   :  { %v2049_v56 = vpop.f32.mrf.mxu0 }
  0xf7   :  { %403 = vadd.xlane.f32.xlu1 %v2574_v18  ;;  %v497_v60 = vmul.f32 %v2638_v53, %v2638_v53  ;;  %v2655_v1 = vadd.f32 %v2049_v56, %v2493_v44 }
  0xf8   :  { %v316_v59 = vpop.f32.mrf.mxu0 }
  0xf9   :  { %529 = vadd.xlane.f32.xlu0 %v489_v21  ;;  %v2650_v61 = vadd.f32 %v316_v59, %v2493_v44  ;;  %v500_v6 = vmul.f32 %v2655_v1, %v2655_v1 }
  0xfa   :  { %v2052_v0 = vpop.f32.mrf.mxu0 }
  0xfb   :  { %531 = vadd.xlane.f32.xlu1 %v490_v24  ;;  %v499_v4 = vmul.f32 %v2650_v61, %v2650_v61  ;;  %v2667_v9 = vadd.f32 %v2052_v0, %v2493_v44 }
  0xfc   :  { %v326_v2 = vpop.f32.mrf.mxu0 }
  0xfd   :  { %405 = vadd.xlane.f32.xlu0 %v2587_v23  ;;  %v2662_v5 = vadd.f32 %v326_v2, %v2493_v44  ;;  %v502_v14 = vmul.f32 %v2667_v9, %v2667_v9 }
  0xfe   :  { %v2055_v7 = vpop.f32.mrf.mxu0 }
  0xff   :  { %407 = vadd.xlane.f32.xlu1 %v2598_v28  ;;  %v501_v11 = vmul.f32 %v2662_v5, %v2662_v5  ;;  %v2679_v16 = vadd.f32 %v2055_v7, %v2493_v44 }
 0x100   :  { %v336_v10 = vpop.f32.mrf.mxu0 }
 0x101   :  { %533 = vadd.xlane.f32.xlu0 %v491_v31  ;;  %v2674_v12 = vadd.f32 %v336_v10, %v2493_v44  ;;  %v504_v21 = vmul.f32 %v2679_v16, %v2679_v16 }
 0x102   :  { %v2058_v15 = vpop.f32.mrf.mxu0 }
 0x103   :  { %535 = vadd.xlane.f32.xlu1 %v492_v34  ;;  %v503_v19 = vmul.f32 %v2674_v12, %v2674_v12  ;;  %v2691_v24 = vadd.f32 %v2058_v15, %v2493_v44 }
 0x104   :  { %v346_v17 = vpop.f32.mrf.mxu0 }
 0x105   :  { %409 = vadd.xlane.f32.xlu0 %v2611_v33  ;;  %v2686_v20 = vadd.f32 %v346_v17, %v2493_v44  ;;  %v506_v29 = vmul.f32 %v2691_v24, %v2691_v24 }
 0x106   :  { %v2061_v22 = vpop.f32.mrf.mxu0 }
 0x107   :  { %411 = vadd.xlane.f32.xlu1 %v2619_v37  ;;  %v505_v26 = vmul.f32 %v2686_v20, %v2686_v20  ;;  %v2703_v31 = vadd.f32 %v2061_v22, %v2493_v44 }
 0x108   :  { %v356_v25 = vpop.f32.mrf.mxu0 }
 0x109   :  { %537 = vadd.xlane.f32.xlu0 %v493_v39  ;;  %v2698_v27 = vadd.f32 %v356_v25, %v2493_v44  ;;  %v508_v35 = vmul.f32 %v2703_v31, %v2703_v31 }
 0x10a   :  { %v2064_v30 = vpop.f32.mrf.mxu0 }
 0x10b   :  { %539 = vadd.xlane.f32.xlu1 %v494_v45  ;;  %v507_v32 = vmul.f32 %v2698_v27, %v2698_v27  ;;  %v2715_v39 = vadd.f32 %v2064_v30, %v2493_v44 }
 0x10c   :  { %v366_v34 = vpop.f32.mrf.mxu0 }
 0x10d   :  { %413 = vadd.xlane.f32.xlu0 %v2626_v42  ;;  %v2712_v36 = vadd.f32 %v366_v34, %v2493_v44  ;;  %v510_v50 = vmul.f32 %v2715_v39, %v2715_v39 }
 0x10e   :  { %v2067_v38 = vpop.f32.mrf.mxu0 }
 0x10f   :  { %415 = vadd.xlane.f32.xlu1 %v2631_v49  ;;  %v509_v45 = vmul.f32 %v2712_v36, %v2712_v36 }
 0x110   :  { %v376_v47 = vpop.f32.mrf.mxu0 }
 0x111   :  { %541 = vadd.xlane.f32.xlu0 %v495_v51  ;;  %v2724_v51 = vadd.f32 %v376_v47, %v2493_v44 }
 0x113   :  { %543 = vadd.xlane.f32.xlu1 %v496_v54  ;;  %v2727_v54 = vadd.f32 %v2067_v38, %v2493_v44  ;;  %v511_v56 = vmul.f32 %v2724_v51, %v2724_v51 }
 0x115   :  { %417 = vadd.xlane.f32.xlu0 %v2638_v53  ;;  %v512_v59 = vmul.f32 %v2727_v54, %v2727_v54 }
 0x117   :  { %419 = vadd.xlane.f32.xlu1 %v2643_v57 }
 0x119   :  { %545 = vadd.xlane.f32.xlu0 %v497_v60 }
 0x11b   :  { %547 = vadd.xlane.f32.xlu1 %v498_v63 }
 0x11d   :  { %421 = vadd.xlane.f32.xlu0 %v2650_v61 }
 0x11f   :  { %423 = vadd.xlane.f32.xlu1 %v2655_v1 }
 0x121   :  { %549 = vadd.xlane.f32.xlu0 %v499_v4 }
 0x123   :  { %551 = vadd.xlane.f32.xlu1 %v500_v6 }
 0x125   :  { %425 = vadd.xlane.f32.xlu0 %v2662_v5 }
 0x127   :  { %427 = vadd.xlane.f32.xlu1 %v2667_v9 }
 0x129   :  { %553 = vadd.xlane.f32.xlu0 %v501_v11 }
 0x12b   :  { %555 = vadd.xlane.f32.xlu1 %v502_v14 }
 0x12d   :  { %429 = vadd.xlane.f32.xlu0 %v2674_v12 }
 0x12f   :  { %431 = vadd.xlane.f32.xlu1 %v2679_v16 }
 0x131   :  { %557 = vadd.xlane.f32.xlu0 %v503_v19 }
 0x133   :  { %559 = vadd.xlane.f32.xlu1 %v504_v21 }
 0x135   :  { %433 = vadd.xlane.f32.xlu0 %v2686_v20 }
 0x137   :  { %435 = vadd.xlane.f32.xlu1 %v2691_v24 }
 0x139   :  { %561 = vadd.xlane.f32.xlu0 %v505_v26 }
 0x13b   :  { %563 = vadd.xlane.f32.xlu1 %v506_v29 }
 0x13d   :  { %437 = vadd.xlane.f32.xlu0 %v2698_v27 }
 0x13f   :  { %439 = vadd.xlane.f32.xlu1 %v2703_v31 }
 0x141   :  { %565 = vadd.xlane.f32.xlu0 %v507_v32 }
 0x143   :  { %567 = vadd.xlane.f32.xlu1 %v508_v35 }
 0x145   :  { %441 = vadd.xlane.f32.xlu0 %v2712_v36 }
 0x147   :  { %443 = vadd.xlane.f32.xlu1 %v2715_v39 }
 0x149   :  { %569 = vadd.xlane.f32.xlu0 %v509_v45 }
 0x14b   :  { %571 = vadd.xlane.f32.xlu1 %v510_v50 }
 0x14d   :  { %445 = vadd.xlane.f32.xlu0 %v2724_v51 }
 0x14f   :  { %447 = vadd.xlane.f32.xlu1 %v2727_v54 }
 0x151   :  { %573 = vadd.xlane.f32.xlu0 %v511_v56 }
 0x153   :  { %575 = vadd.xlane.f32.xlu1 %v512_v59 }
 0x15e   :  { %v388_v60 = vpop.xlane.xlu0 %387 }
 0x15f   :  { %v450_v63 = vmul.f32 0.01, %v388_v60 }
 0x160   :  { %v516_v0 = vpop.xlane.xlu1 %515 }
 0x161   :  { %v610_v2 = vmul.f32 %v450_v63, %v450_v63  ;;  %v578_v4 = vmul.f32 0.01, %v516_v0 }
 0x162   :  { %v386_v44 = vpop.xlane.xlu0 %385 }
 0x163   :  { %v642_v6 = vsub.f32 %v578_v4, %v610_v2  ;;  %v2735_v7 = vmul.f32 0.01, %v386_v44 }
 0x164   :  { %v514_v10 = vpop.xlane.xlu1 %513 }
 0x165   :  { %v674_v11 = vmax.f32 %v642_v6, 0.0  ;;  %v609_v14 = vmul.f32 %v2735_v7, %v2735_v7  ;;  %v577_v15 = vmul.f32 0.01, %v514_v10 }
 0x166   :  { %v390_v17 = vpop.xlane.xlu0 %389 }
 0x167   :  { %v738_v19 = vadd.f32 1e-05, %v674_v11  ;;  %v641_v21 = vsub.f32 %v577_v15, %v609_v14  ;;  %v2739_v22 = vmul.f32 0.01, %v390_v17  ;;  %v835_v11 = vsub.s32 1, %v2484_v41 }
 0x168   :  { %v392_v25 = vpop.xlane.xlu1 %391 }
 0x169   :  { %2152 = vrsqrt.f32 %v738_v19  ;;  %v673_v26 = vmax.f32 %v641_v21, 0.0  ;;  %v2741_v29 = vmul.f32 0.01, %v392_v25  ;;  %v611_v34 = vmul.f32 %v2739_v22, %v2739_v22 }
 0x16a   :  { %v518_v30 = vpop.xlane.xlu0 %517  ;;  %v706_v19 = vsub.f32 %v2496_v46, %v450_v63  ;;  %v871_v25 = vsub.s32 2, %v2484_v41 }
 0x16b   :  { %v737_v32 = vadd.f32 1e-05, %v673_v26  ;;  %v579_v35 = vmul.f32 0.01, %v518_v30  ;;  %v612_v45 = vmul.f32 %v2741_v29, %v2741_v29 }
 0x16c   :  { %v520_v38 = vpop.xlane.xlu1 %519  ;;  %v2764_v63 = vrot.slane %v2490_v43, %v871_v25 }
 0x16d   :  { %2154 = vrsqrt.f32 %v737_v32  ;;  %v643_v47 = vsub.f32 %v579_v35, %v611_v34  ;;  %v580_v50 = vmul.f32 0.01, %v520_v38  ;;  %v2759_v38 = vrot.slane %v2490_v43, %v835_v11 }
 0x16e   :  { %v394_v56 = vpop.xlane.xlu0 %393 }
 0x16f   :  { %v675_v59 = vmax.f32 %v643_v47, 0.0  ;;  %v644_v60 = vsub.f32 %v580_v50, %v612_v45  ;;  %v2747_v0 = vmul.f32 0.01, %v394_v56 }
 0x170   :  { %v396_v2 = vpop.xlane.xlu1 %395 }
 0x171   :  { %v739_v4 = vadd.f32 1e-05, %v675_v59  ;;  %v676_v44 = vmax.f32 %v644_v60, 0.0  ;;  %v2749_v6 = vmul.f32 0.01, %v396_v2  ;;  %v613_v15 = vmul.f32 %v2747_v0, %v2747_v0 }
 0x172   :  { %v522_v10 = vpop.xlane.xlu0 %521  ;;  %v705_v59 = vsub.f32 %v2499_v48, %v2735_v7 }
 0x173   :  { %2156 = vrsqrt.f32 %v739_v4  ;;  %v740_v14 = vadd.f32 1e-05, %v676_v44  ;;  %v581_v17 = vmul.f32 0.01, %v522_v10  ;;  %v614_v26 = vmul.f32 %v2749_v6, %v2749_v6 }
 0x174   :  { %v524_v21 = vpop.xlane.xlu1 %523 }
 0x175   :  { %2158 = vrsqrt.f32 %v740_v14  ;;  %v645_v30 = vsub.f32 %v581_v17, %v613_v15  ;;  %v582_v32 = vmul.f32 0.01, %v524_v21 }
 0x176   :  { %v2153_v34 = vpop.eup %2152  ;;  %v398_v35 = vpop.xlane.xlu0 %397 }
 0x177   :  { %v677_v45 = vmax.f32 %v645_v30, 0.0  ;;  %v646_v47 = vsub.f32 %v582_v32, %v614_v26  ;;  %v2761_v50 = vmul.f32 0.01, %v398_v35  ;;  %v802_v56 = vmul.f32 %v2153_v34, %v706_v19 }
 0x178   :  { %v400_v46 = vpop.xlane.xlu1 %399 }
 0x179   :  { %v741_v60 = vadd.f32 1e-05, %v677_v45  ;;  %v678_v2 = vmax.f32 %v646_v47, 0.0  ;;  %v615_v44 = vmul.f32 %v2761_v50, %v2761_v50  ;;  %v2770_v10 = vmul.f32 0.01, %v400_v46 }
 0x17a   :  { %v2155_v4 = vpop.eup %2154  ;;  %v526_v11 = vpop.xlane.xlu0 %525  ;;  %v838_v14 = vmul.f32 %v2759_v38, %v802_v56  ;;  %v707_v56 = vsub.f32 %v2505_v52, %v2739_v22 }
 0x17b   :  { %2160 = vrsqrt.f32 %v741_v60  ;;  %v742_v15 = vadd.f32 1e-05, %v678_v2  ;;  %v583_v17 = vmul.f32 0.01, %v526_v11  ;;  %v801_v19 = vmul.f32 %v2155_v4, %v705_v59 }
 0x17c   :  { %v616_v43 = vmul.f32 %v2770_v10, %v2770_v10  ;;  %v528_v21 = vpop.xlane.xlu1 %527  ;;  %v874_v48 = vadd.f32 %v2764_v63, %v838_v14  ;;  %v708_v59 = vsub.f32 %v2511_v55, %v2741_v29 }
 0x17d   :  { %2162 = vrsqrt.f32 %v742_v15  ;;  %v647_v7 = vsub.f32 %v583_v17, %v615_v44  ;;  %v584_v25 = vmul.f32 0.01, %v528_v21  ;;  %v837_v26 = vmul.f32 %v2759_v38, %v801_v19 }
 0x17e   :  { %v402_v30 = vpop.xlane.xlu0 %401  ;;  %v906_v4 = vmax.f32 %v874_v48, 0.0 }
 0x17f   :  { %v679_v32 = vmax.f32 %v647_v7, 0.0  ;;  %v648_v34 = vsub.f32 %v584_v25, %v616_v43  ;;  %v2777_v35 = vmul.f32 0.01, %v402_v30  ;;  %v873_v45 = vadd.f32 %v2764_v63, %v837_v26 }
 0x180   :  { %v2157_v47 = vpop.eup %2156  ;;  %v404_v46 = vpop.xlane.xlu1 %403 }
 0x181   :  { %v743_v60 = vadd.f32 1e-05, %v679_v32  ;;  %v680_v2 = vmax.f32 %v648_v34, 0.0  ;;  %v617_v11 = vmul.f32 %v2777_v35, %v2777_v35  ;;  %v2786_v14 = vmul.f32 0.01, %v404_v46 }
 0x182   :  { %v2159_v44 = vpop.eup %2158  ;;  %v530_v15 = vpop.xlane.xlu0 %529  ;;  %v905_v17 = vmax.f32 %v873_v45, 0.0  ;;  %v803_v19 = vmul.f32 %v2157_v47, %v707_v56  ;;  %v709_v46 = vsub.f32 %v2518_v58, %v2747_v0 }
 0x183   :  { %2164 = vrsqrt.f32 %v743_v60  ;;  %v744_v43 = vadd.f32 1e-05, %v680_v2  ;;  %v585_v21 = vmul.f32 0.01, %v530_v15  ;;  %v804_v52 = vmul.f32 %v2159_v44, %v708_v59 }
 0x184   :  { %v618_v22 = vmul.f32 %v2786_v14, %v2786_v14  ;;  %2100 = vmatprep.mubr.f32.mxu1 %v905_v17  ;;  %v532_v55 = vpop.xlane.xlu1 %531  ;;  %v839_v29 = vmul.f32 %v2759_v38, %v803_v19  ;;  %v710_v2 = vsub.f32 %v2526_v62, %v2749_v6 }
 0x185   :  { %2166 = vrsqrt.f32 %v744_v43  ;;  %v649_v48 = vsub.f32 %v585_v21, %v617_v11  ;;  %2101 = vmatmul.mubr.f32.vlgmr.msra.gmra.mxu1 %v906_v4  ;;  %v586_v7 = vmul.f32 0.01, %v532_v55  ;;  %v840_v25 = vmul.f32 %v2759_v38, %v804_v52 }
 0x186   :  { %v406_v26 = vpop.xlane.xlu0 %405  ;;  %v875_v30 = vadd.f32 %v2764_v63, %v839_v29 }
 0x187   :  { %v681_v32 = vmax.f32 %v649_v48, 0.0  ;;  %v650_v34 = vsub.f32 %v586_v7, %v618_v22  ;;  %v2793_v45 = vmul.f32 0.01, %v406_v26  ;;  %v876_v47 = vadd.f32 %v2764_v63, %v840_v25 }
 0x188   :  { %v2161_v56 = vpop.eup %2160  ;;  %v408_v59 = vpop.xlane.xlu1 %407  ;;  %v907_v60 = vmax.f32 %v875_v30, 0.0 }
 0x189   :  { %v745_v4 = vadd.f32 1e-05, %v681_v32  ;;  %v682_v44 = vmax.f32 %v650_v34, 0.0  ;;  %v619_v15 = vmul.f32 %v2793_v45, %v2793_v45  ;;  %v2802_v17 = vmul.f32 0.01, %v408_v59 }
 0x18a   :  { %v2163_v11 = vpop.eup %2162  ;;  %2103 = vmatprep.mubr.f32.mxu1 %v907_v60  ;;  %v534_v19 = vpop.xlane.xlu0 %533  ;;  %v908_v43 = vmax.f32 %v876_v47, 0.0  ;;  %v805_v21 = vmul.f32 %v2161_v56, %v709_v46  ;;  %v711_v56 = vsub.f32 %v2539_v3, %v2761_v50  ;;  %v712_v60 = vsub.f32 %v2550_v8, %v2770_v10 }
 0x18b   :  { %2168 = vrsqrt.f32 %v745_v4  ;;  %v746_v52 = vadd.f32 1e-05, %v682_v44  ;;  %v587_v58 = vmul.f32 0.01, %v534_v19  ;;  %v806_v0 = vmul.f32 %v2163_v11, %v710_v2 }
 0x18c   :  { %v620_v22 = vmul.f32 %v2802_v17, %v2802_v17  ;;  %2104 = vmatmul.mubr.f32.gmra.mxu1 %v908_v43  ;;  %v536_v62 = vpop.xlane.xlu1 %535  ;;  %v841_v6 = vmul.f32 %v2759_v38, %v805_v21 }
 0x18d   :  { %2170 = vrsqrt.f32 %v746_v52  ;;  %v651_v55 = vsub.f32 %v587_v58, %v619_v15  ;;  %v588_v29 = vmul.f32 0.01, %v536_v62  ;;  %v842_v48 = vmul.f32 %v2759_v38, %v806_v0 }
 0x18e   :  { %v410_v7 = vpop.xlane.xlu0 %409  ;;  %v877_v25 = vadd.f32 %v2764_v63, %v841_v6 }
 0x18f   :  { %v683_v26 = vmax.f32 %v651_v55, 0.0  ;;  %v652_v30 = vsub.f32 %v588_v29, %v620_v22  ;;  %v2809_v32 = vmul.f32 0.01, %v410_v7  ;;  %v878_v34 = vadd.f32 %v2764_v63, %v842_v48 }
 0x190   :  { %v2165_v47 = vpop.eup %2164  ;;  %v412_v46 = vpop.xlane.xlu1 %411  ;;  %v909_v59 = vmax.f32 %v877_v25, 0.0 }
 0x191   :  { %v747_v2 = vadd.f32 1e-05, %v683_v26  ;;  %v684_v4 = vmax.f32 %v652_v30, 0.0  ;;  %v621_v11 = vmul.f32 %v2809_v32, %v2809_v32  ;;  %v2818_v15 = vmul.f32 0.01, %v412_v46 }
 0x192   :  { %v2167_v44 = vpop.eup %2166  ;;  %2106 = vmatprep.mubr.f32.mxu1 %v909_v59  ;;  %v538_v19 = vpop.xlane.xlu0 %537  ;;  %v910_v43 = vmax.f32 %v878_v34, 0.0  ;;  %v807_v21 = vmul.f32 %v2165_v47, %v711_v56  ;;  %v713_v30 = vsub.f32 %v2563_v13, %v2777_v35  ;;  %v714_v56 = vsub.f32 %v2574_v18, %v2786_v14 }
 0x193   :  { %2172 = vrsqrt.f32 %v747_v2  ;;  %v748_v52 = vadd.f32 1e-05, %v684_v4  ;;  %v589_v3 = vmul.f32 0.01, %v538_v19  ;;  %v808_v50 = vmul.f32 %v2167_v44, %v712_v60 }
 0x194   :  { %v622_v58 = vmul.f32 %v2818_v15, %v2818_v15  ;;  %2107 = vmatmul.mubr.f32.gmra.mxu1 %v910_v43  ;;  %v540_v8 = vpop.xlane.xlu1 %539  ;;  %v843_v10 = vmul.f32 %v2759_v38, %v807_v21 }
 0x195   :  { %2174 = vrsqrt.f32 %v748_v52  ;;  %v653_v0 = vsub.f32 %v589_v3, %v621_v11  ;;  %v590_v22 = vmul.f32 0.01, %v540_v8  ;;  %v844_v62 = vmul.f32 %v2759_v38, %v808_v50 }
 0x196   :  { %v414_v6 = vpop.xlane.xlu0 %413  ;;  %v879_v55 = vadd.f32 %v2764_v63, %v843_v10 }
 0x197   :  { %v685_v29 = vmax.f32 %v653_v0, 0.0  ;;  %v654_v48 = vsub.f32 %v590_v22, %v622_v58  ;;  %v2825_v7 = vmul.f32 0.01, %v414_v6  ;;  %v880_v25 = vadd.f32 %v2764_v63, %v844_v62 }
 0x198   :  { %v2169_v26 = vpop.eup %2168  ;;  %v416_v34 = vpop.xlane.xlu1 %415  ;;  %v911_v47 = vmax.f32 %v879_v55, 0.0  ;;  %v715_v55 = vsub.f32 %v2587_v23, %v2793_v45 }
 0x199   :  { %v749_v46 = vadd.f32 1e-05, %v685_v29  ;;  %v686_v59 = vmax.f32 %v654_v48, 0.0  ;;  %v623_v2 = vmul.f32 %v2825_v7, %v2825_v7  ;;  %v2834_v4 = vmul.f32 0.01, %v416_v34 }
 0x19a   :  { %v2171_v60 = vpop.eup %2170  ;;  %2109 = vmatprep.mubr.f32.mxu1 %v911_v47  ;;  %v542_v44 = vpop.xlane.xlu0 %541  ;;  %v912_v11 = vmax.f32 %v880_v25, 0.0  ;;  %v809_v19 = vmul.f32 %v2169_v26, %v713_v30  ;;  %v716_v25 = vsub.f32 %v2598_v28, %v2802_v17 }
 0x19b   :  { %2176 = vrsqrt.f32 %v749_v46  ;;  %v750_v43 = vadd.f32 1e-05, %v686_v59  ;;  %v591_v13 = vmul.f32 0.01, %v542_v44  ;;  %v810_v35 = vmul.f32 %v2171_v60, %v714_v56 }
 0x19c   :  { %v624_v21 = vmul.f32 %v2834_v4, %v2834_v4  ;;  %2110 = vmatmul.mubr.f32.gmra.mxu1 %v912_v11  ;;  %v544_v18 = vpop.xlane.xlu1 %543  ;;  %v845_v14 = vmul.f32 %v2759_v38, %v809_v19 }
 0x19d   :  { %2178 = vrsqrt.f32 %v750_v43  ;;  %v655_v52 = vsub.f32 %v591_v13, %v623_v2  ;;  %v592_v3 = vmul.f32 0.01, %v544_v18  ;;  %v846_v50 = vmul.f32 %v2759_v38, %v810_v35 }
 0x19e   :  { %v418_v58 = vpop.xlane.xlu0 %417  ;;  %v881_v8 = vadd.f32 %v2764_v63, %v845_v14 }
 0x19f   :  { %v687_v10 = vmax.f32 %v655_v52, 0.0  ;;  %v656_v0 = vsub.f32 %v592_v3, %v624_v21  ;;  %v2841_v22 = vmul.f32 0.01, %v418_v58  ;;  %v882_v62 = vadd.f32 %v2764_v63, %v846_v50 }
 0x1a0   :  { %v2173_v6 = vpop.eup %2172  ;;  %v420_v29 = vpop.xlane.xlu1 %419  ;;  %v913_v48 = vmax.f32 %v881_v8, 0.0  ;;  %v717_v50 = vsub.f32 %v2611_v33, %v2809_v32 }
 0x1a1   :  { %v751_v26 = vadd.f32 1e-05, %v687_v10  ;;  %v688_v30 = vmax.f32 %v656_v0, 0.0  ;;  %v625_v47 = vmul.f32 %v2841_v22, %v2841_v22  ;;  %v2850_v56 = vmul.f32 0.01, %v420_v29 }
 0x1a2   :  { %v2175_v34 = vpop.eup %2174  ;;  %2112 = vmatprep.mubr.f32.mxu1 %v913_v48  ;;  %v546_v46 = vpop.xlane.xlu0 %545  ;;  %v914_v59 = vmax.f32 %v882_v62, 0.0  ;;  %v811_v60 = vmul.f32 %v2173_v6, %v715_v55  ;;  %v718_v10 = vsub.f32 %v2619_v37, %v2818_v15 }
 0x1a3   :  { %2180 = vrsqrt.f32 %v751_v26  ;;  %v752_v2 = vadd.f32 1e-05, %v688_v30  ;;  %v593_v23 = vmul.f32 0.01, %v546_v46  ;;  %v812_v45 = vmul.f32 %v2175_v34, %v716_v25 }
 0x1a4   :  { %v626_v44 = vmul.f32 %v2850_v56, %v2850_v56  ;;  %2113 = vmatmul.mubr.f32.gmra.mxu1 %v914_v59  ;;  %v548_v28 = vpop.xlane.xlu1 %547  ;;  %v847_v17 = vmul.f32 %v2759_v38, %v811_v60 }
 0x1a5   :  { %2182 = vrsqrt.f32 %v752_v2  ;;  %v657_v11 = vsub.f32 %v593_v23, %v625_v47  ;;  %v594_v19 = vmul.f32 0.01, %v548_v28  ;;  %v848_v43 = vmul.f32 %v2759_v38, %v812_v45 }
 0x1a6   :  { %v422_v13 = vpop.xlane.xlu0 %421  ;;  %v883_v35 = vadd.f32 %v2764_v63, %v847_v17 }
 0x1a7   :  { %v689_v21 = vmax.f32 %v657_v11, 0.0  ;;  %v658_v18 = vsub.f32 %v594_v19, %v626_v44  ;;  %v2857_v14 = vmul.f32 0.01, %v422_v13  ;;  %v884_v52 = vadd.f32 %v2764_v63, %v848_v43 }
 0x1a8   :  { %v2177_v3 = vpop.eup %2176  ;;  %v424_v58 = vpop.xlane.xlu1 %423  ;;  %v915_v8 = vmax.f32 %v883_v35, 0.0  ;;  %v719_v11 = vsub.f32 %v2626_v42, %v2825_v7  ;;  %v720_v13 = vsub.f32 %v2631_v49, %v2834_v4 }
 0x1a9   :  { %v753_v0 = vadd.f32 1e-05, %v689_v21  ;;  %v690_v62 = vmax.f32 %v658_v18, 0.0  ;;  %v627_v55 = vmul.f32 %v2857_v14, %v2857_v14  ;;  %v2866_v29 = vmul.f32 0.01, %v424_v58 }
 0x1aa   :  { %v2179_v6 = vpop.eup %2178  ;;  %2115 = vmatprep.mubr.f32.mxu1 %v915_v8  ;;  %v550_v48 = vpop.xlane.xlu0 %549  ;;  %v916_v25 = vmax.f32 %v884_v52, 0.0  ;;  %v813_v26 = vmul.f32 %v2177_v3, %v717_v50 }
 0x1ab   :  { %2184 = vrsqrt.f32 %v753_v0  ;;  %v754_v30 = vadd.f32 1e-05, %v690_v62  ;;  %v595_v33 = vmul.f32 0.01, %v550_v48  ;;  %v814_v32 = vmul.f32 %v2179_v6, %v718_v10 }
 0x1ac   :  { %v628_v34 = vmul.f32 %v2866_v29, %v2866_v29  ;;  %2116 = vmatmul.mubr.f32.gmra.mxu1 %v916_v25  ;;  %v552_v37 = vpop.xlane.xlu1 %551  ;;  %v849_v15 = vmul.f32 %v2759_v38, %v813_v26 }
 0x1ad   :  { %2186 = vrsqrt.f32 %v754_v30  ;;  %v659_v47 = vsub.f32 %v595_v33, %v627_v55  ;;  %v596_v46 = vmul.f32 0.01, %v552_v37  ;;  %v850_v59 = vmul.f32 %v2759_v38, %v814_v32 }
 0x1ae   :  { %v426_v60 = vpop.xlane.xlu0 %425  ;;  %v885_v2 = vadd.f32 %v2764_v63, %v849_v15  ;;  %v721_v37 = vsub.f32 %v2638_v53, %v2841_v22 }
 0x1af   :  { %v691_v23 = vmax.f32 %v659_v47, 0.0  ;;  %v660_v45 = vsub.f32 %v596_v46, %v628_v34  ;;  %v2873_v44 = vmul.f32 0.01, %v426_v60  ;;  %v886_v28 = vadd.f32 %v2764_v63, %v850_v59 }
 0x1b0   :  { %v2181_v17 = vpop.eup %2180  ;;  %v428_v19 = vpop.xlane.xlu1 %427  ;;  %v917_v43 = vmax.f32 %v885_v2, 0.0  ;;  %v722_v46 = vsub.f32 %v2643_v57, %v2850_v56 }
 0x1b1   :  { %v755_v35 = vadd.f32 1e-05, %v691_v23  ;;  %v692_v21 = vmax.f32 %v660_v45, 0.0  ;;  %v629_v52 = vmul.f32 %v2873_v44, %v2873_v44  ;;  %v2882_v3 = vmul.f32 0.01, %v428_v19 }
 0x1b2   :  { %v2183_v18 = vpop.eup %2182  ;;  %2118 = vmatprep.mubr.f32.mxu1 %v917_v43  ;;  %v554_v50 = vpop.xlane.xlu0 %553  ;;  %v918_v58 = vmax.f32 %v886_v28, 0.0  ;;  %v815_v8 = vmul.f32 %v2181_v17, %v719_v11 }
 0x1b3   :  { %2188 = vrsqrt.f32 %v755_v35  ;;  %v756_v10 = vadd.f32 1e-05, %v692_v21  ;;  %v597_v42 = vmul.f32 0.01, %v554_v50  ;;  %v816_v7 = vmul.f32 %v2183_v18, %v720_v13 }
 0x1b4   :  { %v630_v0 = vmul.f32 %v2882_v3, %v2882_v3  ;;  %2119 = vmatmul.mubr.f32.gmra.mxu1 %v918_v58  ;;  %v556_v49 = vpop.xlane.xlu1 %555  ;;  %v851_v4 = vmul.f32 %v2759_v38, %v815_v8 }
 0x1b5   :  { %2190 = vrsqrt.f32 %v756_v10  ;;  %v661_v62 = vsub.f32 %v597_v42, %v629_v52  ;;  %v598_v6 = vmul.f32 0.01, %v556_v49  ;;  %v852_v55 = vmul.f32 %v2759_v38, %v816_v7 }
 0x1b6   :  { %v430_v48 = vpop.xlane.xlu0 %429  ;;  %v887_v25 = vadd.f32 %v2764_v63, %v851_v4  ;;  %v723_v7 = vsub.f32 %v2650_v61, %v2857_v14  ;;  %v724_v4 = vsub.f32 %v2655_v1, %v2866_v29 }
 0x1b7   :  { %v693_v26 = vmax.f32 %v661_v62, 0.0  ;;  %v662_v30 = vsub.f32 %v598_v6, %v630_v0  ;;  %v2889_v33 = vmul.f32 0.01, %v430_v48  ;;  %v888_v32 = vadd.f32 %v2764_v63, %v852_v55 }
 0x1b8   :  { %v2185_v34 = vpop.eup %2184  ;;  %v432_v15 = vpop.xlane.xlu1 %431  ;;  %v919_v47 = vmax.f32 %v887_v25, 0.0 }
 0x1b9   :  { %v757_v59 = vadd.f32 1e-05, %v693_v26  ;;  %v694_v60 = vmax.f32 %v662_v30, 0.0  ;;  %v631_v23 = vmul.f32 %v2889_v33, %v2889_v33  ;;  %v2898_v45 = vmul.f32 0.01, %v432_v15 }
 0x1ba   :  { %v2187_v2 = vpop.eup %2186  ;;  %2121 = vmatprep.mubr.f32.mxu1 %v919_v47  ;;  %v558_v28 = vpop.xlane.xlu0 %557  ;;  %v920_v17 = vmax.f32 %v888_v32, 0.0  ;;  %v817_v11 = vmul.f32 %v2185_v34, %v721_v37 }
 0x1bb   :  { %2192 = vrsqrt.f32 %v757_v59  ;;  %v758_v19 = vadd.f32 1e-05, %v694_v60  ;;  %v599_v53 = vmul.f32 0.01, %v558_v28  ;;  %v818_v22 = vmul.f32 %v2187_v2, %v722_v46 }
 0x1bc   :  { %v632_v43 = vmul.f32 %v2898_v45, %v2898_v45  ;;  %2122 = vmatmul.mubr.f32.gmra.mxu1 %v920_v17  ;;  %v560_v57 = vpop.xlane.xlu1 %559  ;;  %v853_v56 = vmul.f32 %v2759_v38, %v817_v11 }
 0x1bd   :  { %2194 = vrsqrt.f32 %v758_v19  ;;  %v663_v13 = vsub.f32 %v599_v53, %v631_v23  ;;  %v600_v35 = vmul.f32 0.01, %v560_v57  ;;  %v854_v21 = vmul.f32 %v2759_v38, %v818_v22 }
 0x1be   :  { %v434_v18 = vpop.xlane.xlu0 %433  ;;  %v889_v52 = vadd.f32 %v2764_v63, %v853_v56  ;;  %v725_v19 = vsub.f32 %v2662_v5, %v2873_v44 }
 0x1bf   :  { %v695_v50 = vmax.f32 %v663_v13, 0.0  ;;  %v664_v58 = vsub.f32 %v600_v35, %v632_v43  ;;  %v2905_v8 = vmul.f32 0.01, %v434_v18  ;;  %v890_v10 = vadd.f32 %v2764_v63, %v854_v21 }
 0x1c0   :  { %v2189_v42 = vpop.eup %2188  ;;  %v436_v0 = vpop.xlane.xlu1 %435  ;;  %v921_v49 = vmax.f32 %v889_v52, 0.0  ;;  %v726_v43 = vsub.f32 %v2667_v9, %v2882_v3 }
 0x1c1   :  { %v759_v62 = vadd.f32 1e-05, %v695_v50  ;;  %v696_v6 = vmax.f32 %v664_v58, 0.0  ;;  %v633_v48 = vmul.f32 %v2905_v8, %v2905_v8  ;;  %v2914_v25 = vmul.f32 0.01, %v436_v0 }
 0x1c2   :  { %v2191_v55 = vpop.eup %2190  ;;  %2124 = vmatprep.mubr.f32.mxu1 %v921_v49  ;;  %v562_v26 = vpop.xlane.xlu0 %561  ;;  %v922_v30 = vmax.f32 %v890_v10, 0.0  ;;  %v819_v32 = vmul.f32 %v2189_v42, %v723_v7 }
 0x1c3   :  { %2196 = vrsqrt.f32 %v759_v62  ;;  %v760_v34 = vadd.f32 1e-05, %v696_v6  ;;  %v601_v61 = vmul.f32 0.01, %v562_v26  ;;  %v820_v14 = vmul.f32 %v2191_v55, %v724_v4 }
 0x1c4   :  { %v634_v37 = vmul.f32 %v2914_v25, %v2914_v25  ;;  %2125 = vmatmul.mubr.f32.gmra.mxu1 %v922_v30  ;;  %v564_v1 = vpop.xlane.xlu1 %563  ;;  %v855_v29 = vmul.f32 %v2759_v38, %v819_v32  ;;  %v727_v30 = vsub.f32 %v2674_v12, %v2889_v33 }
 0x1c5   :  { %2198 = vrsqrt.f32 %v760_v34  ;;  %v665_v15 = vsub.f32 %v601_v61, %v633_v48  ;;  %v602_v47 = vmul.f32 0.01, %v564_v1  ;;  %v856_v46 = vmul.f32 %v2759_v38, %v820_v14 }
 0x1c6   :  { %v438_v59 = vpop.xlane.xlu0 %437  ;;  %v891_v60 = vadd.f32 %v2764_v63, %v855_v29  ;;  %v728_v61 = vsub.f32 %v2679_v16, %v2898_v45 }
 0x1c7   :  { %v697_v2 = vmax.f32 %v665_v15, 0.0  ;;  %v666_v23 = vsub.f32 %v602_v47, %v634_v37  ;;  %v2921_v28 = vmul.f32 0.01, %v438_v59  ;;  %v892_v17 = vadd.f32 %v2764_v63, %v856_v46 }
 0x1c8   :  { %v2193_v11 = vpop.eup %2192  ;;  %v440_v53 = vpop.xlane.xlu1 %439  ;;  %v923_v22 = vmax.f32 %v891_v60, 0.0 }
 0x1c9   :  { %v761_v57 = vadd.f32 1e-05, %v697_v2  ;;  %v698_v56 = vmax.f32 %v666_v23, 0.0  ;;  %v635_v13 = vmul.f32 %v2921_v28, %v2921_v28  ;;  %v2930_v21 = vmul.f32 0.01, %v440_v53 }
 0x1ca   :  { %v2195_v35 = vpop.eup %2194  ;;  %2127 = vmatprep.mubr.f32.mxu1 %v923_v22  ;;  %v566_v18 = vpop.xlane.xlu0 %565  ;;  %v924_v52 = vmax.f32 %v892_v17, 0.0  ;;  %v821_v50 = vmul.f32 %v2193_v11, %v725_v19 }
 0x1cb   :  { %2200 = vrsqrt.f32 %v761_v57  ;;  %v762_v58 = vadd.f32 1e-05, %v698_v56  ;;  %v603_v5 = vmul.f32 0.01, %v566_v18  ;;  %v822_v44 = vmul.f32 %v2195_v35, %v726_v43 }
 0x1cc   :  { %v636_v10 = vmul.f32 %v2930_v21, %v2930_v21  ;;  %2128 = vmatmul.mubr.f32.gmra.mxu1 %v924_v52  ;;  %v568_v9 = vpop.xlane.xlu1 %567  ;;  %v857_v3 = vmul.f32 %v2759_v38, %v821_v50  ;;  %v729_v35 = vsub.f32 %v2686_v20, %v2905_v8  ;;  %v730_v50 = vsub.f32 %v2691_v24, %v2914_v25 }
 0x1cd   :  { %2202 = vrsqrt.f32 %v762_v58  ;;  %v667_v42 = vsub.f32 %v603_v5, %v635_v13  ;;  %v604_v7 = vmul.f32 0.01, %v568_v9  ;;  %v858_v0 = vmul.f32 %v2759_v38, %v822_v44 }
 0x1ce   :  { %v442_v49 = vpop.xlane.xlu0 %441  ;;  %v893_v4 = vadd.f32 %v2764_v63, %v857_v3 }
 0x1cf   :  { %v699_v62 = vmax.f32 %v667_v42, 0.0  ;;  %v668_v6 = vsub.f32 %v604_v7, %v636_v10  ;;  %v2937_v55 = vmul.f32 0.01, %v442_v49  ;;  %v894_v48 = vadd.f32 %v2764_v63, %v858_v0 }
 0x1d0   :  { %v2197_v26 = vpop.eup %2196  ;;  %v444_v32 = vpop.xlane.xlu1 %443  ;;  %v925_v34 = vmax.f32 %v893_v4, 0.0 }
 0x1d1   :  { %v763_v14 = vadd.f32 1e-05, %v699_v62  ;;  %v700_v37 = vmax.f32 %v668_v6, 0.0  ;;  %v637_v1 = vmul.f32 %v2937_v55, %v2937_v55  ;;  %v2946_v15 = vmul.f32 0.01, %v444_v32 }
 0x1d2   :  { %v2199_v29 = vpop.eup %2198  ;;  %2130 = vmatprep.mubr.f32.mxu1 %v925_v34  ;;  %v570_v47 = vpop.xlane.xlu0 %569  ;;  %v926_v46 = vmax.f32 %v894_v48, 0.0  ;;  %v823_v59 = vmul.f32 %v2197_v26, %v727_v30  ;;  %v731_v26 = vsub.f32 %v2698_v27, %v2921_v28 }
 0x1d3   :  { %2204 = vrsqrt.f32 %v763_v14  ;;  %v764_v60 = vadd.f32 1e-05, %v700_v37  ;;  %v605_v12 = vmul.f32 0.01, %v570_v47  ;;  %v824_v33 = vmul.f32 %v2199_v29, %v728_v61 }
 0x1d4   :  { %v638_v2 = vmul.f32 %v2946_v15, %v2946_v15  ;;  %2131 = vmatmul.mubr.f32.gmra.mxu1 %v926_v46  ;;  %v572_v16 = vpop.xlane.xlu1 %571  ;;  %v859_v45 = vmul.f32 %v2759_v38, %v823_v59  ;;  %v732_v14 = vsub.f32 %v2703_v31, %v2930_v21  ;;  %v733_v31 = vsub.f32 %v2712_v36, %v2937_v55 }
 0x1d5   :  { %2206 = vrsqrt.f32 %v764_v60  ;;  %v669_v23 = vsub.f32 %v605_v12, %v637_v1  ;;  %v606_v17 = vmul.f32 0.01, %v572_v16  ;;  %v860_v11 = vmul.f32 %v2759_v38, %v824_v33 }
 0x1d6   :  { %v446_v19 = vpop.xlane.xlu0 %445  ;;  %v895_v53 = vadd.f32 %v2764_v63, %v859_v45  ;;  %v734_v45 = vsub.f32 %v2715_v39, %v2946_v15 }
 0x1d7   :  { %v701_v22 = vmax.f32 %v669_v23, 0.0  ;;  %v670_v43 = vsub.f32 %v606_v17, %v638_v2  ;;  %v2953_v57 = vmul.f32 0.01, %v446_v19  ;;  %v896_v56 = vadd.f32 %v2764_v63, %v860_v11 }
 0x1d8   :  { %v2201_v13 = vpop.eup %2200  ;;  %v448_v18 = vpop.xlane.xlu1 %447  ;;  %v927_v52 = vmax.f32 %v895_v53, 0.0 }
 0x1d9   :  { %v765_v58 = vadd.f32 1e-05, %v701_v22  ;;  %v702_v5 = vmax.f32 %v670_v43, 0.0  ;;  %v639_v44 = vmul.f32 %v2953_v57, %v2953_v57  ;;  %v2962_v9 = vmul.f32 0.01, %v448_v18 }
 0x1da   :  { %v2203_v10 = vpop.eup %2202  ;;  %2133 = vmatprep.mubr.f32.mxu1 %v927_v52  ;;  %v574_v3 = vpop.xlane.xlu0 %573  ;;  %v928_v42 = vmax.f32 %v896_v56, 0.0  ;;  %v825_v7 = vmul.f32 %v2201_v13, %v729_v35  ;;  %v735_v36 = vsub.f32 %v2724_v51, %v2953_v57 }
 0x1db   :  { %2208 = vrsqrt.f32 %v765_v58  ;;  %v766_v0 = vadd.f32 1e-05, %v702_v5  ;;  %v607_v20 = vmul.f32 0.01, %v574_v3  ;;  %v826_v8 = vmul.f32 %v2203_v10, %v730_v50 }
 0x1dc   :  { %v640_v49 = vmul.f32 %v2962_v9, %v2962_v9  ;;  %2134 = vmatmul.mubr.f32.gmra.mxu1 %v928_v42  ;;  %v576_v24 = vpop.xlane.xlu1 %575  ;;  %v861_v25 = vmul.f32 %v2759_v38, %v825_v7  ;;  %v736_v39 = vsub.f32 %v2727_v54, %v2962_v9  ;;  %v955_v7 = vsub.s32 3, %v2484_v41 }
 0x1dd   :  { %2210 = vrsqrt.f32 %v766_v0  ;;  %v671_v4 = vsub.f32 %v607_v20, %v639_v44  ;;  %v608_v62 = vmul.f32 0.01, %v576_v24  ;;  %v862_v6 = vmul.f32 %v2759_v38, %v826_v8 }
 0x1de   :  { %v897_v48 = vadd.f32 %v2764_v63, %v861_v25 }
 0x1df   :  { %v703_v30 = vmax.f32 %v671_v4, 0.0  ;;  %v672_v32 = vsub.f32 %v608_v62, %v640_v49  ;;  %v898_v34 = vadd.f32 %v2764_v63, %v862_v6 }
 0x1e0   :  { %v2205_v61 = vpop.eup %2204  ;;  %v929_v37 = vmax.f32 %v897_v48, 0.0 }
 0x1e1   :  { %v767_v1 = vadd.f32 1e-05, %v703_v30  ;;  %v704_v29 = vmax.f32 %v672_v32, 0.0  ;;  %v930_v47 = vmax.f32 %v898_v34, 0.0  ;;  %v827_v46 = vmul.f32 %v2205_v61, %v731_v26 }
 0x1e2   :  { %v2207_v59 = vpop.eup %2206  ;;  %2136 = vmatprep.mubr.f32.mxu1 %v929_v37 }
 0x1e3   :  { %2212 = vrsqrt.f32 %v767_v1  ;;  %v768_v60 = vadd.f32 1e-05, %v704_v29  ;;  %2137 = vmatmul.mubr.f32.gmra.mxu1 %v930_v47  ;;  %v863_v27 = vmul.f32 %v2759_v38, %v827_v46  ;;  %v828_v28 = vmul.f32 %v2207_v59, %v732_v14 }
 0x1e5   :  { %2214 = vrsqrt.f32 %v768_v60  ;;  %v899_v12 = vadd.f32 %v2764_v63, %v863_v27  ;;  %v864_v33 = vmul.f32 %v2759_v38, %v828_v28 }
 0x1e7   :  { %v931_v21 = vmax.f32 %v899_v12, 0.0  ;;  %v900_v2 = vadd.f32 %v2764_v63, %v864_v33 }
 0x1e8   :  { %v2209_v16 = vpop.eup %2208 }
 0x1e9   :  { %2139 = vmatprep.mubr.f32.mxu1 %v931_v21  ;;  %v932_v23 = vmax.f32 %v900_v2, 0.0  ;;  %v829_v17 = vmul.f32 %v2209_v16, %v733_v31 }
 0x1ea   :  { %v2211_v11 = vpop.eup %2210 }
 0x1eb   :  { %2140 = vmatmul.mubr.f32.gmra.mxu1 %v932_v23  ;;  %v865_v19 = vmul.f32 %v2759_v38, %v829_v17  ;;  %v830_v53 = vmul.f32 %v2211_v11, %v734_v45 }
 0x1ed   :  { %v901_v22 = vadd.f32 %v2764_v63, %v865_v19  ;;  %v866_v43 = vmul.f32 %v2759_v38, %v830_v53 }
 0x1ef   :  { %v933_v55 = vmax.f32 %v901_v22, 0.0  ;;  %v902_v56 = vadd.f32 %v2764_v63, %v866_v43 }
 0x1f0   :  { %v2213_v13 = vpop.eup %2212 }
 0x1f1   :  { %2142 = vmatprep.mubr.f32.mxu1 %v933_v55  ;;  %v934_v15 = vmax.f32 %v902_v56, 0.0  ;;  %v831_v35 = vmul.f32 %v2213_v13, %v735_v36 }
 0x1f2   :  { %v2215_v18 = vpop.eup %2214 }
 0x1f3   :  { %2143 = vmatmul.mubr.f32.gmra.mxu1 %v934_v15  ;;  %v867_v52 = vmul.f32 %v2759_v38, %v831_v35  ;;  %v832_v50 = vmul.f32 %v2215_v18, %v736_v39 }
 0x1f5   :  { %v903_v58 = vadd.f32 %v2764_v63, %v867_v52  ;;  %v868_v5 = vmul.f32 %v2759_v38, %v832_v50  ;;  %v3010_v38 = vld [vmem:[%s3580_s3] sm:$0xff]  ;;  %s2305_s3 = smov [#allocation2]  }
 0x1f6   :  { %s1842_s20 = sshll.u32 %s2305_s3, 4  ;;  %s1843_s20 = int_to_ptr.vmem [resolvable:$true] %s1842_s20 }
 0x1f7   :  { %v935_v51 = vmax.f32 %v903_v58, 0.0  ;;  %v904_v57 = vadd.f32 %v2764_v63, %v868_v5  ;;  %v3013_v63 = vrot.slane %v3010_v38, %v955_v7  ;;  %s2281_s21 = scalar_lea.vmem %s1843_s20, 32  ;;  %p2286_p1 = scmp.lt.s32.totalorder %s1843_s20, %s1843_s20 }
 0x1f8   :  { %p2282_p0 = scmp.ne.s32.totalorder %s1843_s20, %s2281_s21  ;;  %p2287_p2 = scmp.lt.s32.totalorder %s2281_s21, %s2281_s21 }
 0x1f9   :  { %2145 = vmatprep.mubr.f32.mxu1 %v935_v51  ;;  %v936_v44 = vmax.f32 %v904_v57, 0.0 }
 0x1fa   :  { %p2288_p3 = por %p2287_p2, %p2286_p1 }
 0x1fb   :  { %2146 = vmatmul.mubr.f32.gmra.mxu1 %v936_v44 }
 0x1fc   :  { %p2289_p4 = pnand %p2288_p3, %p2282_p0 }
 0x245   :  { %v2994_v10 = vpop.f32.mrf.mxu1 }
 0x247   :  { %v2996_v54 = vpop.f32.mrf.mxu1 }
 0x24c   :  { %v2998_v9 = vpop.f32.mrf.mxu1 }
 0x24d   :  { %v3129_v7 = vadd.f32 %v2998_v9, %v3013_v63 }
 0x24e   :  { %v3000_v3 = vpop.f32.mrf.mxu1 }
 0x24f   :  { %3597 = vst [vmem:[#allocation7_spill] sm:$0xff] %v3129_v7  ;;  %v3144_v9 = vadd.f32 %v3000_v3, %v3013_v63 }
 0x251   :  { %3598 = vst [vmem:[#allocation8_spill] sm:$0xff] %v3144_v9 }
 0x254   :  { %v3002_v42 = vpop.f32.mrf.mxu1 }
 0x255   :  { %v3103_v35 = vadd.f32 %v3002_v42, %v3013_v63 }
 0x256   :  { %v3005_v0 = vpop.f32.mrf.mxu1 }
 0x257   :  { %3595 = vst [vmem:[#allocation5_spill] sm:$0xff] %v3103_v35  ;;  %v1283_v58 = vmul.f32 %v3103_v35, %v3103_v35  ;;  %v3118_v5 = vadd.f32 %v3005_v0, %v3013_v63 }
 0x259   :  { %3596 = vst [vmem:[#allocation6_spill] sm:$0xff] %v3118_v5  ;;  %v1282_v57 = vmul.f32 %v3118_v5, %v3118_v5 }
 0x25c   :  { %v2111_v20 = vpop.f32.mrf.mxu1 }
 0x25d   :  { %v3016_v8 = vadd.f32 %v2111_v20, %v3013_v63 }
 0x25e   :  { %v1053_v24 = vpop.f32.mrf.mxu1 }
 0x25f   :  { %1196 = vadd.xlane.f32.xlu1 %v3016_v8  ;;  %v1285_v49 = vmul.f32 %v3016_v8, %v3016_v8  ;;  %v3093_v56 = vadd.f32 %v1053_v24, %v3013_v63  ;;  %v1281_v24 = vmul.f32 %v3129_v7, %v3129_v7 }
 0x261   :  { %v1284_v13 = vmul.f32 %v3093_v56, %v3093_v56 }
 0x263   :  { %1324 = vadd.xlane.f32.xlu1 %v1285_v49 }
 0x264   :  { %v2114_v25 = vpop.f32.mrf.mxu1 }
 0x265   :  { %v3022_v4 = vadd.f32 %v2114_v25, %v3013_v63 }
 0x266   :  { %v1063_v6 = vpop.f32.mrf.mxu1 }
 0x267   :  { %1200 = vadd.xlane.f32.xlu1 %v3022_v4  ;;  %v1287_v62 = vmul.f32 %v3022_v4, %v3022_v4  ;;  %v3028_v48 = vadd.f32 %v1063_v6, %v3013_v63 }
 0x269   :  { %v1286_v32 = vmul.f32 %v3028_v48, %v3028_v48 }
 0x26b   :  { %1328 = vadd.xlane.f32.xlu1 %v1287_v62  ;;  %v1280_v62 = vmul.f32 %v3144_v9, %v3144_v9 }
 0x26c   :  { %v2117_v26 = vpop.f32.mrf.mxu1 }
 0x26d   :  { %v3032_v30 = vadd.f32 %v2117_v26, %v3013_v63 }
 0x26e   :  { %v1073_v61 = vpop.f32.mrf.mxu1 }
 0x26f   :  { %1198 = vadd.xlane.f32.xlu1 %v3028_v48  ;;  %v1289_v34 = vmul.f32 %v3032_v30, %v3032_v30  ;;  %v3040_v14 = vadd.f32 %v1073_v61, %v3013_v63 }
 0x271   :  { %v1288_v46 = vmul.f32 %v3040_v14, %v3040_v14 }
 0x273   :  { %1204 = vadd.xlane.f32.xlu1 %v3032_v30 }
 0x274   :  { %v2120_v37 = vpop.f32.mrf.mxu1 }
 0x275   :  { %v3044_v1 = vadd.f32 %v2120_v37, %v3013_v63 }
 0x276   :  { %v1083_v29 = vpop.f32.mrf.mxu1 }
 0x277   :  { %1326 = vadd.xlane.f32.xlu1 %v1286_v32  ;;  %v1291_v60 = vmul.f32 %v3044_v1, %v3044_v1  ;;  %v3054_v28 = vadd.f32 %v1083_v29, %v3013_v63  ;;  %v3155_v32 = vadd.f32 %v2994_v10, %v3013_v63  ;;  %v3170_v10 = vadd.f32 %v2996_v54, %v3013_v63 }
 0x279   :  { %v1290_v2 = vmul.f32 %v3054_v28, %v3054_v28  ;;  %3599 = vst [vmem:[#allocation9_spill] sm:$0xff] %v3155_v32  ;;  %v1279_v37 = vmul.f32 %v3155_v32, %v3155_v32  ;;  %3600 = vst [vmem:[#allocation10_spill] sm:$0xff] %v3170_v10 }
 0x27b   :  { %1332 = vadd.xlane.f32.xlu1 %v1289_v34 }
 0x27c   :  { %v2123_v47 = vpop.f32.mrf.mxu1 }
 0x27d   :  { %v3062_v31 = vadd.f32 %v2123_v47, %v3013_v63  ;;  %v1278_v47 = vmul.f32 %v3170_v10, %v3170_v10 }
 0x27e   :  { %v1093_v59 = vpop.f32.mrf.mxu1 }
 0x27f   :  { %1202 = vadd.xlane.f32.xlu1 %v3040_v14  ;;  %v1293_v45 = vmul.f32 %v3062_v31, %v3062_v31  ;;  %v3076_v11 = vadd.f32 %v1093_v59, %v3013_v63 }
 0x281   :  { %v1292_v22 = vmul.f32 %v3076_v11, %v3076_v11 }
 0x283   :  { %1208 = vadd.xlane.f32.xlu1 %v3044_v1 }
 0x284   :  { %v3051_v27 = vpop.f32.mrf.mxu1 }
 0x286   :  { %v3056_v12 = vpop.f32.mrf.mxu1 }
 0x287   :  { %1330 = vadd.xlane.f32.xlu1 %v1288_v46 }
 0x28b   :  { %1336 = vadd.xlane.f32.xlu1 %v1291_v60 }
 0x28c   :  { %v3059_v33 = vpop.f32.mrf.mxu1 }
 0x28e   :  { %v3065_v21 = vpop.f32.mrf.mxu1 }
 0x28f   :  { %1206 = vadd.xlane.f32.xlu1 %v3054_v28 }
 0x293   :  { %1212 = vadd.xlane.f32.xlu1 %v3062_v31 }
 0x294   :  { %v3069_v16 = vpop.f32.mrf.mxu1 }
 0x296   :  { %v3073_v23 = vpop.f32.mrf.mxu1 }
 0x297   :  { %1334 = vadd.xlane.f32.xlu1 %v1290_v2 }
 0x29b   :  { %1340 = vadd.xlane.f32.xlu1 %v1293_v45 }
 0x29c   :  { %v2135_v17 = vpop.f32.mrf.mxu1 }
 0x29d   :  { %v3079_v19 = vadd.f32 %v2135_v17, %v3013_v63 }
 0x29e   :  { %v3083_v53 = vpop.f32.mrf.mxu1 }
 0x29f   :  { %1210 = vadd.xlane.f32.xlu1 %v3076_v11  ;;  %1228 = vadd.xlane.f32.xlu0 %v3079_v19  ;;  %v1301_v43 = vmul.f32 %v3079_v19, %v3079_v19  ;;  %v3187_v2 = vadd.f32 %v3083_v53, %v3013_v63 }
 0x2a3   :  { %1338 = vadd.xlane.f32.xlu1 %v1292_v22  ;;  %1356 = vadd.xlane.f32.xlu0 %v1301_v43  ;;  %v2138_v36 = vpop.f32.mrf.mxu1  ;;  %v1300_v22 = vmul.f32 %v3187_v2, %v3187_v2 }
 0x2a4   :  { %v3090_v55 = vadd.f32 %v2138_v36, %v3013_v63  ;;  %v3194_v36 = vadd.f32 %v3069_v16, %v3013_v63 }
 0x2a5   :  { %v1143_v15 = vpop.f32.mrf.mxu1 }
 0x2a6   :  { %v1303_v39 = vmul.f32 %v3090_v55, %v3090_v55  ;;  %v3106_v18 = vadd.f32 %v1143_v15, %v3013_v63 }
 0x2a7   :  { %1194 = vadd.xlane.f32.xlu1 %v3093_v56  ;;  %1232 = vadd.xlane.f32.xlu0 %v3090_v55 }
 0x2a8   :  { %v1302_v51 = vmul.f32 %v3106_v18, %v3106_v18 }
 0x2ab   :  { %1322 = vadd.xlane.f32.xlu1 %v1284_v13  ;;  %1360 = vadd.xlane.f32.xlu0 %v1303_v39  ;;  %v2141_v52 = vpop.f32.mrf.mxu1 }
 0x2ac   :  { %v3111_v50 = vadd.f32 %v2141_v52, %v3013_v63 }
 0x2ad   :  { %v1153_v42 = vpop.f32.mrf.mxu1 }
 0x2ae   :  { %v1305_v44 = vmul.f32 %v3111_v50, %v3111_v50  ;;  %v3132_v0 = vadd.f32 %v1153_v42, %v3013_v63  ;;  %v3201_v42 = vadd.f32 %v3073_v23, %v3013_v63 }
 0x2af   :  { %1192 = vadd.xlane.f32.xlu1 %v3103_v35  ;;  %1230 = vadd.xlane.f32.xlu0 %v3106_v18 }
 0x2b0   :  { %v1304_v25 = vmul.f32 %v3132_v0, %v3132_v0  ;;  %3601 = vst [vmem:[#allocation11_spill] sm:$0xff] %v3201_v42 }
 0x2b3   :  { %1320 = vadd.xlane.f32.xlu1 %v1283_v58  ;;  %1236 = vadd.xlane.f32.xlu0 %v3111_v50  ;;  %v2144_v20 = vpop.f32.mrf.mxu1 }
 0x2b4   :  { %v3137_v49 = vadd.f32 %v2144_v20, %v3013_v63 }
 0x2b5   :  { %v1163_v26 = vpop.f32.mrf.mxu1 }
 0x2b6   :  { %v1307_v6 = vmul.f32 %v3137_v49, %v3137_v49  ;;  %v3158_v3 = vadd.f32 %v1163_v26, %v3013_v63 }
 0x2b7   :  { %1190 = vadd.xlane.f32.xlu1 %v3118_v5  ;;  %1358 = vadd.xlane.f32.xlu0 %v1302_v51  ;;  %v1299_v51 = vmul.f32 %v3194_v36, %v3194_v36 }
 0x2b8   :  { %v1306_v29 = vmul.f32 %v3158_v3, %v3158_v3 }
 0x2bb   :  { %1318 = vadd.xlane.f32.xlu1 %v1282_v57  ;;  %1364 = vadd.xlane.f32.xlu0 %v1305_v44  ;;  %v2147_v34 = vpop.f32.mrf.mxu1 }
 0x2bc   :  { %v3163_v61 = vadd.f32 %v2147_v34, %v3013_v63 }
 0x2bd   :  { %v1173_v59 = vpop.f32.mrf.mxu1 }
 0x2be   :  { %v1309_v46 = vmul.f32 %v3163_v61, %v3163_v61  ;;  %v3180_v60 = vadd.f32 %v1173_v59, %v3013_v63 }
 0x2bf   :  { %1188 = vadd.xlane.f32.xlu1 %v3129_v7  ;;  %1234 = vadd.xlane.f32.xlu0 %v3132_v0 }
 0x2c0   :  { %v1308_v54 = vmul.f32 %v3180_v60, %v3180_v60 }
 0x2c3   :  { %1316 = vadd.xlane.f32.xlu1 %v1281_v24  ;;  %1240 = vadd.xlane.f32.xlu0 %v3137_v49 }
 0x2c7   :  { %1186 = vadd.xlane.f32.xlu1 %v3144_v9  ;;  %1362 = vadd.xlane.f32.xlu0 %v1304_v25 }
 0x2cb   :  { %1314 = vadd.xlane.f32.xlu1 %v1280_v62  ;;  %1368 = vadd.xlane.f32.xlu0 %v1307_v6  ;;  %v1298_v6 = vmul.f32 %v3201_v42, %v3201_v42 }
 0x2cf   :  { %1184 = vadd.xlane.f32.xlu1 %v3155_v32  ;;  %1238 = vadd.xlane.f32.xlu0 %v3158_v3 }
 0x2d3   :  { %1312 = vadd.xlane.f32.xlu1 %v1279_v37  ;;  %1244 = vadd.xlane.f32.xlu0 %v3163_v61  ;;  %v3210_v37 = vadd.f32 %v3059_v33, %v3013_v63  ;;  %v3222_v33 = vadd.f32 %v3065_v21, %v3013_v63  ;;  %v3234_v21 = vadd.f32 %v3051_v27, %v3013_v63 }
 0x2d5   :  { %3602 = vst [vmem:[#allocation12_spill] sm:$0xff] %v3210_v37  ;;  %3603 = vst [vmem:[#allocation13_spill] sm:$0xff] %v3222_v33 }
 0x2d6   :  { %3604 = vst [vmem:[#allocation14_spill] sm:$0xff] %v3234_v21 }
 0x2d7   :  { %1182 = vadd.xlane.f32.xlu1 %v3170_v10  ;;  %1366 = vadd.xlane.f32.xlu0 %v1306_v29 }
 0x2db   :  { %1310 = vadd.xlane.f32.xlu1 %v1278_v47  ;;  %1372 = vadd.xlane.f32.xlu0 %v1309_v46 }
 0x2df   :  { %1242 = vadd.xlane.f32.xlu0 %v3180_v60 }
 0x2e3   :  { %1370 = vadd.xlane.f32.xlu0 %v1308_v54  ;;  %v1297_v54 = vmul.f32 %v3210_v37, %v3210_v37 }
 0x2e7   :  { %1226 = vadd.xlane.f32.xlu0 %v3187_v2 }
 0x2e8   :  { %v1197_v45 = vpop.xlane.xlu1 %1196 }
 0x2e9   :  { %v1253_v17 = vmul.f32 0.01, %v1197_v45 }
 0x2eb   :  { %1354 = vadd.xlane.f32.xlu0 %v1300_v22  ;;  %v1413_v13 = vmul.f32 %v1253_v17, %v1253_v17  ;;  %v1509_v47 = vsub.f32 %v3016_v8, %v1253_v17 }
 0x2ec   :  { %v1325_v43 = vpop.xlane.xlu1 %1324 }
 0x2ed   :  { %v1381_v39 = vmul.f32 0.01, %v1325_v43 }
 0x2ef   :  { %v1445_v15 = vsub.f32 %v1381_v39, %v1413_v13  ;;  %1224 = vadd.xlane.f32.xlu0 %v3194_v36 }
 0x2f0   :  { %v1201_v53 = vpop.xlane.xlu1 %1200 }
 0x2f1   :  { %v1477_v52 = vmax.f32 %v1445_v15, 0.0  ;;  %v1255_v58 = vmul.f32 0.01, %v1201_v53  ;;  %v1296_v53 = vmul.f32 %v3222_v33, %v3222_v33 }
 0x2f3   :  { %v1541_v57 = vadd.f32 1e-05, %v1477_v52  ;;  %1352 = vadd.xlane.f32.xlu0 %v1299_v51  ;;  %v1415_v16 = vmul.f32 %v1255_v58, %v1255_v58  ;;  %v1511_v8 = vsub.f32 %v3022_v4, %v1255_v58  ;;  %v1295_v4 = vmul.f32 %v3234_v21, %v3234_v21 }
 0x2f4   :  { %v1329_v44 = vpop.xlane.xlu1 %1328  ;;  %v3243_v58 = vadd.f32 %v3056_v12, %v3013_v63 }
 0x2f5   :  { %2216 = vrsqrt.f32 %v1541_v57  ;;  %v1383_v20 = vmul.f32 0.01, %v1329_v44 }
 0x2f6   :  { %3605 = vst [vmem:[#allocation15_spill] sm:$0xff] %v3243_v58 }
 0x2f7   :  { %v1447_v24 = vsub.f32 %v1383_v20, %v1415_v16  ;;  %1222 = vadd.xlane.f32.xlu0 %v3201_v42 }
 0x2f8   :  { %v1199_v25 = vpop.xlane.xlu1 %1198 }
 0x2f9   :  { %v1479_v62 = vmax.f32 %v1447_v24, 0.0  ;;  %v1254_v23 = vmul.f32 0.01, %v1199_v25  ;;  %v1294_v24 = vmul.f32 %v3243_v58, %v3243_v58 }
 0x2fb   :  { %v1543_v26 = vadd.f32 1e-05, %v1479_v62  ;;  %1350 = vadd.xlane.f32.xlu0 %v1298_v6  ;;  %v1414_v46 = vmul.f32 %v1254_v23, %v1254_v23  ;;  %v1510_v44 = vsub.f32 %v3028_v48, %v1254_v23 }
 0x2fc   :  { %v3206_v34 = vpop.xlane.xlu1 %1204 }
 0x2fd   :  { %2218 = vrsqrt.f32 %v1543_v26 }
 0x2ff   :  { %1220 = vadd.xlane.f32.xlu0 %v3210_v37 }
 0x300   :  { %v1327_v29 = vpop.xlane.xlu1 %1326 }
 0x301   :  { %v1382_v59 = vmul.f32 0.01, %v1327_v29 }
 0x302   :  { %v2217_v45 = vpop.eup %2216 }
 0x303   :  { %v1446_v22 = vsub.f32 %v1382_v59, %v1414_v46  ;;  %1348 = vadd.xlane.f32.xlu0 %v1297_v54  ;;  %v3216_v43 = vmul.f32 %v2217_v45, %v1509_v47 }
 0x304   :  { %v3218_v13 = vpop.xlane.xlu1 %1332 }
 0x305   :  { %v1478_v39 = vmax.f32 %v1446_v22, 0.0 }
 0x307   :  { %v1542_v15 = vadd.f32 1e-05, %v1478_v39  ;;  %1218 = vadd.xlane.f32.xlu0 %v3222_v33 }
 0x308   :  { %v3226_v17 = vpop.xlane.xlu1 %1202 }
 0x309   :  { %2220 = vrsqrt.f32 %v1542_v15 }
 0x30a   :  { %v2219_v52 = vpop.eup %2218 }
 0x30b   :  { %1346 = vadd.xlane.f32.xlu0 %v1296_v53  ;;  %v3230_v51 = vmul.f32 %v2219_v52, %v1511_v8 }
 0x30c   :  { %v3236_v57 = vpop.xlane.xlu1 %1208 }
 0x30f   :  { %1216 = vadd.xlane.f32.xlu0 %v3234_v21 }
 0x310   :  { %v3246_v16 = vpop.xlane.xlu1 %1330 }
 0x313   :  { %1344 = vadd.xlane.f32.xlu0 %v1295_v4 }
 0x314   :  { %v1337_v25 = vpop.xlane.xlu1 %1336 }
 0x316   :  { %v2221_v20 = vpop.eup %2220 }
 0x317   :  { %1214 = vadd.xlane.f32.xlu0 %v3243_v58  ;;  %v3249_v27 = vmul.f32 %v2221_v20, %v1510_v44 }
 0x318   :  { %v3253_v62 = vpop.xlane.xlu1 %1206 }
 0x31b   :  { %1342 = vadd.xlane.f32.xlu0 %v1294_v24 }
 0x31c   :  { %v1213_v6 = vpop.xlane.xlu1 %1212 }
 0x320   :  { %v3255_v29 = vpop.xlane.xlu1 %1334 }
 0x324   :  { %v1341_v45 = vpop.xlane.xlu1 %1340 }
 0x328   :  { %v1229_v26 = vpop.xlane.xlu0 %1228  ;;  %v1211_v4 = vpop.xlane.xlu1 %1210 }
 0x329   :  { %v1269_v63 = vmul.f32 0.01, %v1229_v26  ;;  %v3304_v7 = vmul.f32 0.01, %v1211_v4 }
 0x32b   :  { %v1429_v48 = vmul.f32 %v1269_v63, %v1269_v63  ;;  %v1420_v4 = vmul.f32 %v3304_v7, %v3304_v7 }
 0x32c   :  { %v1357_v12 = vpop.xlane.xlu0 %1356 }
 0x32d   :  { %v1397_v23 = vmul.f32 0.01, %v1357_v12  ;;  %v1339_v12 = vpop.xlane.xlu1 %1338 }
 0x32f   :  { %v1461_v47 = vsub.f32 %v1397_v23, %v1429_v48 }
 0x330   :  { %v1233_v46 = vpop.xlane.xlu0 %1232 }
 0x331   :  { %v1493_v59 = vmax.f32 %v1461_v47, 0.0  ;;  %v1271_v54 = vmul.f32 0.01, %v1233_v46 }
 0x333   :  { %v1557_v22 = vadd.f32 1e-05, %v1493_v59  ;;  %v1431_v15 = vmul.f32 %v1271_v54, %v1271_v54  ;;  %v1525_v59 = vsub.f32 %v3079_v19, %v1269_v63  ;;  %v1527_v63 = vsub.f32 %v3090_v55, %v1271_v54 }
 0x334   :  { %v1361_v39 = vpop.xlane.xlu0 %1360  ;;  %v3290_v54 = vmul.f32 0.01, %v1213_v6  ;;  %v3302_v6 = vmul.f32 0.01, %v3226_v17 }
 0x335   :  { %2222 = vrsqrt.f32 %v1557_v22  ;;  %v1399_v8 = vmul.f32 0.01, %v1361_v39 }
 0x337   :  { %v1463_v53 = vsub.f32 %v1399_v8, %v1431_v15  ;;  %v3583_v15 = vrot.slane %v3010_v38, 6  ;;  %v3265_v8 = vpop.xlane.xlu1 %1194 }
 0x338   :  { %v1231_v52 = vpop.xlane.xlu0 %1230 }
 0x339   :  { %v1495_v44 = vmax.f32 %v1463_v53, 0.0  ;;  %v1270_v26 = vmul.f32 0.01, %v1231_v52  ;;  %2002 = vmatprep.mubr.f32.mxu0 %v3583_v15 }
 0x33b   :  { %v1559_v20 = vadd.f32 1e-05, %v1495_v44  ;;  %v1430_v23 = vmul.f32 %v1270_v26, %v1270_v26 }
 0x33c   :  { %v3257_v24 = vpop.xlane.xlu0 %1236 }
 0x33d   :  { %2224 = vrsqrt.f32 %v1559_v20  ;;  %v2303_v20 = vmov 0  }
 0x33e   :  { %2151 = vset.pattern.permute.xlu0 %v2303_v20  ;;  %v1385_v20 = vmul.f32 0.01, %v3218_v13  ;;  %v1421_v13 = vmul.f32 %v3290_v54, %v3290_v54 }
 0x33f   :  { %1736 = vperm.xlu0 %2151, %v3010_v38  }
 0x340   :  { %v1359_v48 = vpop.xlane.xlu0 %1358 }
 0x341   :  { %v1398_v47 = vmul.f32 0.01, %v1359_v48  ;;  %v3273_v48 = vpop.xlane.xlu1 %1322 }
 0x342   :  { %v2223_v46 = vpop.eup %2222 }
 0x343   :  { %v1462_v40 = vsub.f32 %v1398_v47, %v1430_v23  ;;  %v3262_v39 = vmul.f32 %v2223_v46, %v1525_v59  ;;  %v3283_v59 = vmul.f32 0.01, %v3206_v34  ;;  %v1389_v34 = vmul.f32 0.01, %v1341_v45 }
 0x344   :  { %v3260_v22 = vpop.xlane.xlu0 %1364  ;;  %v1388_v45 = vmul.f32 0.01, %v1339_v12  ;;  %v1386_v12 = vmul.f32 0.01, %v3255_v29 }
 0x345   :  { %v1494_v53 = vmax.f32 %v1462_v40, 0.0  ;;  %v3278_v40 = vmul.f32 0.01, %v3236_v57  ;;  %v1417_v57 = vmul.f32 %v3283_v59, %v3283_v59  ;;  %v1453_v33 = vsub.f32 %v1389_v34, %v1421_v13 }
 0x347   :  { %v1558_v52 = vadd.f32 1e-05, %v1494_v53  ;;  %v3285_v53 = vpop.xlane.xlu1 %1192  ;;  %v1419_v55 = vmul.f32 %v3278_v40, %v3278_v40  ;;  %v1449_v10 = vsub.f32 %v1385_v20, %v1417_v57 }
 0x348   :  { %v3269_v44 = vpop.xlane.xlu0 %1234 }
 0x349   :  { %2226 = vrsqrt.f32 %v1558_v52  ;;  %v1387_v52 = vmul.f32 0.01, %v1337_v25 }
 0x34a   :  { %v2225_v19 = vpop.eup %2224 }
 0x34b   :  { %v3275_v47 = vmul.f32 %v2225_v19, %v1527_v63  ;;  %v1526_v63 = vsub.f32 %v3106_v18, %v1270_v26  ;;  %v1451_v58 = vsub.f32 %v1387_v52, %v1419_v55  ;;  %v3295_v21 = vpop.xlane.xlu1 %1320  ;;  %v1481_v18 = vmax.f32 %v1449_v10, 0.0 }
 0x34c   :  { %v1241_v23 = vpop.xlane.xlu0 %1240  ;;  %v1384_v26 = vmul.f32 0.01, %v3246_v16  ;;  %v3312_v55 = vmul.f32 0.01, %v3253_v62 }
 0x34d   :  { %v1483_v9 = vmax.f32 %v1451_v58, 0.0  ;;  %v3307_v52 = vmul.f32 0.01, %v1241_v23  ;;  %v1485_v58 = vmax.f32 %v1453_v33, 0.0  ;;  %v1452_v23 = vsub.f32 %v1388_v45, %v1420_v4 }
 0x34e   :  { %v1418_v62 = vmul.f32 %v3312_v55, %v3312_v55 }
 0x34f   :  { %v3314_v57 = vpop.xlane.xlu1 %1190  ;;  %v1547_v17 = vadd.f32 1e-05, %v1483_v9  ;;  %v1435_v34 = vmul.f32 %v3307_v52, %v3307_v52  ;;  %v1549_v33 = vadd.f32 1e-05, %v1485_v58  ;;  %v1484_v45 = vmax.f32 %v1452_v23, 0.0 }
 0x350   :  { %v3280_v46 = vpop.xlane.xlu0 %1362  ;;  %v1401_v58 = vmul.f32 0.01, %v3260_v22 }
 0x351   :  { %2228 = vrsqrt.f32 %v1547_v17  ;;  %v1548_v23 = vadd.f32 1e-05, %v1484_v45 }
 0x354   :  { %v1369_v19 = vpop.xlane.xlu0 %1368 }
 0x355   :  { %v1403_v10 = vmul.f32 0.01, %v1369_v19 }
 0x356   :  { %v2227_v15 = vpop.eup %2226 }
 0x357   :  { %v3297_v25 = vmul.f32 %v2227_v15, %v1526_v63  ;;  %v1416_v15 = vmul.f32 %v3302_v6, %v3302_v6  ;;  %v1545_v63 = vadd.f32 1e-05, %v1481_v18  ;;  %v1467_v5 = vsub.f32 %v1403_v10, %v1435_v34 }
 0x358   :  { %v1239_v32 = vpop.xlane.xlu0 %1238  ;;  %v1450_v18 = vsub.f32 %v1386_v12, %v1418_v62 }
 0x359   :  { %v1448_v16 = vsub.f32 %v1384_v26, %v1416_v15  ;;  %v3323_v37 = vmul.f32 0.01, %v1239_v32  ;;  %2230 = vrsqrt.f32 %v1545_v63  ;;  %v3327_v26 = vpop.xlane.xlu1 %1318  ;;  %v3330_v15 = vmul.f32 0.01, %v3257_v24 }
 0x35a   :  { %2232 = vrsqrt.f32 %v1549_v33  ;;  %v1499_v10 = vmax.f32 %v1467_v5, 0.0  ;;  %v1400_v5 = vmul.f32 0.01, %v3280_v46  ;;  %v1632_v46 = vsub.s32 4, %v2484_v41 }
 0x35b   :  { %v1480_v19 = vmax.f32 %v1448_v16, 0.0  ;;  %v1434_v32 = vmul.f32 %v3323_v37, %v3323_v37  ;;  %v1482_v16 = vmax.f32 %v1450_v18, 0.0  ;;  %v1433_v24 = vmul.f32 %v3330_v15, %v3330_v15 }
 0x35c   :  { %v1245_v20 = vpop.xlane.xlu0 %1244  ;;  %v1563_v22 = vadd.f32 1e-05, %v1499_v10 }
 0x35d   :  { %v3325_v9 = vmul.f32 0.01, %v1245_v20  ;;  %v1544_v63 = vadd.f32 1e-05, %v1480_v19  ;;  %v3342_v42 = vpop.xlane.xlu1 %1188  ;;  %v1465_v33 = vsub.f32 %v1401_v58, %v1433_v24  ;;  %v1546_v19 = vadd.f32 1e-05, %v1482_v16 }
 0x35e   :  { %v2229_v58 = vpop.eup %2228  ;;  %v1513_v24 = vsub.f32 %v3032_v30, %v3283_v59 }
 0x35f   :  { %v1437_v20 = vmul.f32 %v3325_v9, %v3325_v9  ;;  %2234 = vrsqrt.f32 %v1544_v63 }
 0x360   :  { %v1367_v13 = vpop.xlane.xlu0 %1366  ;;  %2236 = vrsqrt.f32 %v1548_v23 }
 0x361   :  { %v1402_v29 = vmul.f32 0.01, %v1367_v13  ;;  %v3340_v13 = vmul.f32 0.01, %v3269_v44  ;;  %v3352_v10 = vpop.xlane.xlu1 %1316 }
 0x363   :  { %v1466_v12 = vsub.f32 %v1402_v29, %v1434_v32  ;;  %v1432_v45 = vmul.f32 %v3340_v13, %v3340_v13 }
 0x364   :  { %v1373_v4 = vpop.xlane.xlu0 %1372 }
 0x365   :  { %v1405_v17 = vmul.f32 0.01, %v1373_v4  ;;  %v1498_v18 = vmax.f32 %v1466_v12, 0.0  ;;  %v1515_v12 = vsub.f32 %v3044_v1, %v3278_v40  ;;  %v1517_v1 = vsub.f32 %v3062_v31, %v3290_v54  ;;  %v3366_v59 = vpop.xlane.xlu1 %1186 }
 0x366   :  { %v2231_v16 = vpop.eup %2230  ;;  %v1512_v31 = vsub.f32 %v3040_v14, %v3302_v6  ;;  %v1516_v14 = vsub.f32 %v3076_v11, %v3304_v7  ;;  %v1531_v11 = vsub.f32 %v3137_v49, %v3307_v52 }
 0x367   :  { %v1469_v34 = vsub.f32 %v1405_v17, %v1437_v20  ;;  %v1497_v17 = vmax.f32 %v1465_v33, 0.0  ;;  %v1668_v33 = vsub.s32 5, %v2484_v41 }
 0x368   :  { %v1243_v62 = vpop.xlane.xlu0 %1242 }
 0x369   :  { %v1501_v35 = vmax.f32 %v1469_v34, 0.0  ;;  %v3344_v4 = vmul.f32 0.01, %v1243_v62  ;;  %v1464_v34 = vsub.f32 %v1400_v5, %v1432_v45  ;;  %v1561_v5 = vadd.f32 1e-05, %v1497_v17  ;;  %v2233_v45 = vpop.eup %2232 }
 0x36a   :  { %v1613_v17 = vmul.f32 %v2233_v45, %v1517_v1 }
 0x36b   :  { %v1565_v29 = vadd.f32 1e-05, %v1501_v35  ;;  %v1436_v32 = vmul.f32 %v3344_v4, %v3344_v4  ;;  %v1562_v35 = vadd.f32 1e-05, %v1498_v18 }
 0x36c   :  { %v1371_v44 = vpop.xlane.xlu0 %1370 }
 0x36d   :  { %2238 = vrsqrt.f32 %v1565_v29  ;;  %v1404_v20 = vmul.f32 0.01, %v1371_v44  ;;  %v3360_v29 = vrot.slane %v3010_v38, %v1632_v46  ;;  %v1609_v44 = vmul.f32 %v2231_v16, %v1513_v24 }
 0x36e   :  { %2240 = vrsqrt.f32 %v1563_v22  ;;  %v1496_v22 = vmax.f32 %v1464_v34, 0.0  ;;  %v3381_v16 = vmul.f32 0.01, %v3265_v8  ;;  %v3394_v8 = vpop.xlane.xlu1 %1314 }
 0x36f   :  { %2242 = vrsqrt.f32 %v1546_v19  ;;  %v1468_v63 = vsub.f32 %v1404_v20, %v1436_v32  ;;  %v1611_v19 = vmul.f32 %v2229_v58, %v1515_v12  ;;  %v1643_v30 = vmul.f32 %v3360_v29, %v3230_v51  ;;  %v2235_v58 = vpop.eup %2234 }
 0x370   :  { %v1227_v23 = vpop.xlane.xlu0 %1226  ;;  %2244 = vrsqrt.f32 %v1562_v35  ;;  %v3369_v32 = vrot.slane %v3010_v38, %v1668_v33  ;;  %v1560_v20 = vadd.f32 1e-05, %v1496_v22  ;;  %v1645_v46 = vmul.f32 %v3360_v29, %v1609_v44  ;;  %v2237_v35 = vpop.eup %2236 }
 0x371   :  { %v1500_v62 = vmax.f32 %v1468_v63, 0.0  ;;  %v1647_v34 = vmul.f32 %v3360_v29, %v1611_v19  ;;  %v1514_v63 = vsub.f32 %v3054_v28, %v3312_v55  ;;  %v1533_v12 = vsub.f32 %v3163_v61, %v3325_v9 }
 0x372   :  { %v3376_v51 = vadd.f32 %v3369_v32, %v1643_v30  ;;  %v3385_v24 = vmul.f32 0.01, %v1227_v23  ;;  %v1649_v6 = vmul.f32 %v3360_v29, %v1613_v17  ;;  %v1380_v28 = vmul.f32 0.01, %v3273_v48 }
 0x373   :  { %v1564_v18 = vadd.f32 1e-05, %v1500_v62  ;;  %v3391_v33 = vadd.f32 %v3369_v32, %v1647_v34  ;;  %v3397_v61 = vadd.f32 %v3369_v32, %v1645_v46  ;;  %v3400_v23 = vmul.f32 0.01, %v3285_v53 }
 0x374   :  { %v1355_v40 = vpop.xlane.xlu0 %1354  ;;  %v1612_v45 = vmul.f32 %v2237_v35, %v1516_v14  ;;  %v1412_v48 = vmul.f32 %v3381_v16, %v3381_v16  ;;  %v3411_v1 = vmul.f32 %v2235_v58, %v1512_v31  ;;  %v1685_v53 = vadd.f32 %v3369_v32, %v1649_v6  ;;  %v3424_v14 = vpop.xlane.xlu1 %1184 }
 0x375   :  { %2246 = vrsqrt.f32 %v1564_v18  ;;  %v1396_v55 = vmul.f32 0.01, %v1355_v40  ;;  %v1428_v18 = vmul.f32 %v3385_v24, %v3385_v24  ;;  %v1715_v49 = vmax.f32 %v3391_v33, 0.0 }
 0x376   :  { %2248 = vrsqrt.f32 %v1561_v5  ;;  %v1444_v52 = vsub.f32 %v1380_v28, %v1412_v48  ;;  %v1379_v35 = vmul.f32 0.01, %v3295_v21  ;;  %v3431_v21 = vmul.f32 0.01, %v3314_v57 }
 0x377   :  { %2250 = vrsqrt.f32 %v1560_v20  ;;  %v1460_v20 = vsub.f32 %v1396_v55, %v1428_v18  ;;  %v1378_v48 = vmul.f32 0.01, %v3327_v26 }
 0x378   :  { %v1225_v54 = vpop.xlane.xlu0 %1224 }
 0x379   :  { %v3404_v7 = vmul.f32 0.01, %v1225_v54  ;;  %v1411_v54 = vmul.f32 %v3400_v23, %v3400_v23 }
 0x37a   :  { %v2239_v62 = vpop.eup %2238 }
 0x37b   :  { %v2241_v5 = vpop.eup %2240  ;;  %v1629_v22 = vmul.f32 %v2239_v62, %v1533_v12  ;;  %v1427_v58 = vmul.f32 %v3404_v7, %v3404_v7  ;;  %v1648_v12 = vmul.f32 %v3360_v29, %v1612_v45  ;;  %v1530_v62 = vsub.f32 %v3158_v3, %v3323_v37 }
 0x37c   :  { %v2243_v9 = vpop.eup %2242  ;;  %v1353_v19 = vpop.xlane.xlu0 %1352  ;;  %v1627_v30 = vmul.f32 %v2241_v5, %v1531_v11  ;;  %v1492_v45 = vmax.f32 %v1460_v20, 0.0 }
 0x37d   :  { %v1665_v44 = vmul.f32 %v3360_v29, %v1629_v22  ;;  %v1395_v40 = vmul.f32 0.01, %v1353_v19  ;;  %v1610_v34 = vmul.f32 %v2243_v9, %v1514_v63  ;;  %v2245_v46 = vpop.eup %2244  ;;  %v1532_v63 = vsub.f32 %v3180_v60, %v3344_v4 }
 0x37e   :  { %v1717_v22 = vmax.f32 %v1685_v53, 0.0  ;;  %v1663_v9 = vmul.f32 %v3360_v29, %v1627_v30  ;;  %v1476_v19 = vmax.f32 %v1444_v52, 0.0  ;;  %v1626_v37 = vmul.f32 %v2245_v46, %v1530_v62 }
 0x37f   :  { %v1701_v17 = vadd.f32 %v3369_v32, %v1665_v44  ;;  %v1459_v55 = vsub.f32 %v1395_v40, %v1427_v58  ;;  %v1529_v60 = vsub.f32 %v3111_v50, %v3330_v15  ;;  %v1443_v4 = vsub.f32 %v1379_v35, %v1411_v54 }
 0x380   :  { %v1223_v31 = vpop.xlane.xlu0 %1222  ;;  %v1646_v57 = vmul.f32 %v3360_v29, %v1610_v34  ;;  %v1684_v30 = vadd.f32 %v3369_v32, %v1648_v12  ;;  %v1410_v52 = vmul.f32 %v3431_v21, %v3431_v21  ;;  %v1699_v50 = vadd.f32 %v3369_v32, %v1663_v9 }
 0x381   :  { %v3428_v6 = vmul.f32 0.01, %v1223_v31  ;;  %v1733_v5 = vmax.f32 %v1701_v17, 0.0  ;;  %v1491_v20 = vmax.f32 %v1459_v55, 0.0  ;;  %v1313_v17 = vpop.xlane.xlu1 %1312  ;;  %v1556_v46 = vadd.f32 1e-05, %v1492_v45 }
 0x382   :  { %v2247_v28 = vpop.eup %2246  ;;  %v1662_v35 = vmul.f32 %v3360_v29, %v1626_v37  ;;  %v1540_v58 = vadd.f32 1e-05, %v1476_v19  ;;  %v1475_v31 = vmax.f32 %v1443_v4, 0.0  ;;  %v1528_v12 = vsub.f32 %v3132_v0, %v3340_v13 }
 0x383   :  { %v2249_v11 = vpop.eup %2248  ;;  %1970 = vmatprep.subr.mxu0 %v1733_v5  ;;  %v1628_v3 = vmul.f32 %v2247_v28, %v1532_v63  ;;  %v1426_v44 = vmul.f32 %v3428_v6, %v3428_v6  ;;  %v3450_v62 = vmul.f32 0.01, %v3342_v42  ;;  %v1442_v5 = vsub.f32 %v1378_v48, %v1410_v52 }
 0x384   :  { %v1351_v18 = vpop.xlane.xlu0 %1350  ;;  %1971 = vmatpush3.xpose.msra.mxu0 %v1717_v22  ;;  %v1625_v15 = vmul.f32 %v2249_v11, %v1529_v60  ;;  %v2251_v26 = vpop.eup %2250  ;;  %v1716_v22 = vmax.f32 %v1684_v30, 0.0  ;;  %v1377_v9 = vmul.f32 0.01, %v3352_v10  ;;  %v1555_v11 = vadd.f32 1e-05, %v1491_v20 }
 0x385   :  { %v1394_v40 = vmul.f32 0.01, %v1351_v18  ;;  %v1664_v53 = vmul.f32 %v3360_v29, %v1628_v3  ;;  %v1624_v3 = vmul.f32 %v2251_v26, %v1528_v12  ;;  %2252 = vrsqrt.f32 %v1556_v46  ;;  %v1183_v18 = vpop.xlane.xlu1 %1182 }
 0x386   :  { %v1661_v45 = vmul.f32 %v3360_v29, %v1625_v15  ;;  %v1731_v37 = vmax.f32 %v1699_v50, 0.0  ;;  %v1698_v0 = vadd.f32 %v3369_v32, %v1662_v35  ;;  %2254 = vrsqrt.f32 %v1540_v58 }
 0x387   :  { %v1458_v54 = vsub.f32 %v1394_v40, %v1426_v44  ;;  %v1700_v34 = vadd.f32 %v3369_v32, %v1664_v53  ;;  %v1409_v42 = vmul.f32 %v3450_v62, %v3450_v62  ;;  %v3460_v13 = vmul.f32 0.01, %v3366_v59 }
 0x388   :  { %v1221_v63 = vpop.xlane.xlu0 %1220  ;;  %v1682_v10 = vadd.f32 %v3369_v32, %v1646_v57  ;;  %v1539_v4 = vadd.f32 1e-05, %v1475_v31  ;;  %v1474_v48 = vmax.f32 %v1442_v5, 0.0  ;;  %v1376_v30 = vmul.f32 0.01, %v3394_v8 }
 0x389   :  { %v3452_v28 = vmul.f32 0.01, %v1221_v63  ;;  %v1732_v55 = vmax.f32 %v1700_v34, 0.0  ;;  %v1490_v19 = vmax.f32 %v1458_v54, 0.0  ;;  %v1441_v53 = vsub.f32 %v1377_v9, %v1409_v42  ;;  %v1311_v5 = vpop.xlane.xlu1 %1310 }
 0x38a   :  { %2256 = vrsqrt.f32 %v1555_v11  ;;  %v1697_v52 = vadd.f32 %v3369_v32, %v1661_v45  ;;  %v1730_v50 = vmax.f32 %v1698_v0, 0.0  ;;  %v1660_v15 = vmul.f32 %v3360_v29, %v1624_v3 }
 0x38b   :  { %1972 = vmatprep.subr.mxu0 %v1732_v55  ;;  %v1425_v44 = vmul.f32 %v3452_v28, %v3452_v28  ;;  %v1554_v59 = vadd.f32 1e-05, %v1490_v19  ;;  %v1408_v57 = vmul.f32 %v3460_v13, %v3460_v13  ;;  %v3471_v26 = vmul.f32 0.01, %v3424_v14 }
 0x38c   :  { %v1349_v60 = vpop.xlane.xlu0 %1348  ;;  %1973 = vmatpush3.xpose.msra.mxu0 %v1716_v22  ;;  %v1714_v54 = vmax.f32 %v1682_v10, 0.0  ;;  %v1644_v8 = vmul.f32 %v3360_v29, %v3411_v1  ;;  %v1538_v34 = vadd.f32 1e-05, %v1474_v48  ;;  %v1659_v31 = vmul.f32 %v3360_v29, %v3275_v47 }
 0x38d   :  { %v1393_v40 = vmul.f32 0.01, %v1349_v60  ;;  %1974 = vmatprep.subr.mxu0 %v1731_v37  ;;  %2258 = vrsqrt.f32 %v1539_v4  ;;  %v1473_v12 = vmax.f32 %v1441_v53, 0.0  ;;  %v1440_v14 = vsub.f32 %v1376_v30, %v1408_v57 }
 0x38e   :  { %v1375_v63 = vmul.f32 0.01, %v1313_v17  ;;  %2260 = vrsqrt.f32 %v1554_v59  ;;  %v1696_v55 = vadd.f32 %v3369_v32, %v1660_v15  ;;  %v1407_v1 = vmul.f32 %v3471_v26, %v3471_v26 }
 0x38f   :  { %v1457_v20 = vsub.f32 %v1393_v40, %v1425_v44  ;;  %v3484_v22 = vmul.f32 0.01, %v1183_v18  ;;  %v1713_v11 = vmax.f32 %v3397_v61, 0.0  ;;  %v1680_v47 = vadd.f32 %v3369_v32, %v1644_v8 }
 0x390   :  { %v1219_v46 = vpop.xlane.xlu0 %1218  ;;  %1975 = vmatpush3.xpose.msra.mxu0 %v1715_v49  ;;  %v1729_v49 = vmax.f32 %v1697_v52, 0.0  ;;  %2262 = vrsqrt.f32 %v1538_v34  ;;  %v1695_v3 = vadd.f32 %v3369_v32, %v1659_v31  ;;  %v1537_v19 = vadd.f32 1e-05, %v1473_v12 }
 0x391   :  { %v1489_v35 = vmax.f32 %v1457_v20, 0.0  ;;  %v3477_v58 = vmul.f32 0.01, %v1219_v46  ;;  %1976 = vmatprep.subr.mxu0 %v1730_v50  ;;  %v1472_v37 = vmax.f32 %v1440_v14, 0.0  ;;  %v1439_v0 = vsub.f32 %v1375_v63, %v1407_v1 }
 0x392   :  { %v1374_v42 = vmul.f32 0.01, %v1311_v5  ;;  %v1728_v10 = vmax.f32 %v1696_v55, 0.0  ;;  %v1658_v61 = vmul.f32 %v3360_v29, %v3297_v25  ;;  %v2253_v4 = vpop.eup %2252  ;;  %v1508_v48 = vsub.f32 %v3093_v56, %v3381_v16  ;;  %v3606_v55 = vld [vmem:[#allocation5_spill] sm:$0xff] }
 0x393   :  { %v1553_v33 = vadd.f32 1e-05, %v1489_v35  ;;  %v1424_v17 = vmul.f32 %v3477_v58, %v3477_v58  ;;  %v1406_v18 = vmul.f32 %v3484_v22, %v3484_v22  ;;  %v1712_v40 = vmax.f32 %v1680_v47, 0.0  ;;  %v2255_v30 = vpop.eup %2254 }
 0x394   :  { %v1347_v9 = vpop.xlane.xlu0 %1346  ;;  %1977 = vmatpush3.xpose.msra.mxu0 %v1714_v54  ;;  %v1642_v53 = vmul.f32 %v3360_v29, %v3249_v27  ;;  %v1524_v52 = vsub.f32 %v3187_v2, %v3385_v24  ;;  %v1657_v56 = vmul.f32 %v3360_v29, %v3262_v39  ;;  %v1536_v25 = vadd.f32 1e-05, %v1472_v37 }
 0x395   :  { %v1392_v45 = vmul.f32 0.01, %v1347_v9  ;;  %1978 = vmatprep.subr.mxu0 %v1729_v49  ;;  %2264 = vrsqrt.f32 %v1553_v33  ;;  %v1471_v16 = vmax.f32 %v1439_v0, 0.0  ;;  %v1438_v50 = vsub.f32 %v1374_v42, %v1406_v18 }
 0x396   :  { %2266 = vrsqrt.f32 %v1537_v19  ;;  %v1727_v46 = vmax.f32 %v1695_v3, 0.0  ;;  %v1694_v27 = vadd.f32 %v3369_v32, %v1658_v61  ;;  %v1620_v54 = vmul.f32 %v2253_v4, %v1524_v52  ;;  %v3609_v52 = vld [vmem:[#allocation12_spill] sm:$0xff] }
 0x397   :  { %v1456_v60 = vsub.f32 %v1392_v45, %v1424_v17  ;;  %v2257_v15 = vpop.eup %2256  ;;  %v1523_v2 = vsub.f32 %v3194_v36, %v3404_v7  ;;  %v1711_v8 = vmax.f32 %v3376_v51, 0.0  ;;  %v1641_v39 = vmul.f32 %v3360_v29, %v3216_v43  ;;  %v3607_v17 = vld [vmem:[#allocation11_spill] sm:$0xff] }
 0x398   :  { %v1217_v44 = vpop.xlane.xlu0 %1216  ;;  %1979 = vmatpush3.xpose.msra.mxu0 %v1713_v11  ;;  %v1604_v34 = vmul.f32 %v2255_v30, %v1508_v48  ;;  %v1678_v12 = vadd.f32 %v3369_v32, %v1642_v53  ;;  %v1535_v14 = vadd.f32 1e-05, %v1471_v16  ;;  %v1470_v63 = vmax.f32 %v1438_v50, 0.0 }
 0x399   :  { %v1488_v59 = vmax.f32 %v1456_v60, 0.0  ;;  %v3501_v20 = vmul.f32 0.01, %v1217_v44  ;;  %1980 = vmatprep.subr.mxu0 %v1728_v10  ;;  %v1619_v36 = vmul.f32 %v2257_v15, %v1523_v2  ;;  %v1726_v33 = vmax.f32 %v1694_v27, 0.0  ;;  %v3608_v44 = vld [vmem:[#allocation6_spill] sm:$0xff] }
 0x39a   :  { %v2259_v7 = vpop.eup %2258  ;;  %v1693_v51 = vadd.f32 %v3369_v32, %v1657_v56  ;;  %v1656_v43 = vmul.f32 %v3360_v29, %v1620_v54  ;;  %v1507_v1 = vsub.f32 %v3606_v55, %v3400_v23  ;;  %v1677_v11 = vadd.f32 %v3369_v32, %v1641_v39 }
 0x39b   :  { %v1552_v57 = vadd.f32 1e-05, %v1488_v59  ;;  %v1423_v35 = vmul.f32 %v3501_v20, %v3501_v20  ;;  %v2261_v49 = vpop.eup %2260  ;;  %v1640_v47 = vmul.f32 %v3360_v29, %v1604_v34  ;;  %v1522_v45 = vsub.f32 %v3607_v17, %v3428_v6 }
 0x39c   :  { %v1345_v24 = vpop.xlane.xlu0 %1344  ;;  %1981 = vmatpush3.xpose.msra.mxu0 %v1712_v40  ;;  %v1710_v37 = vmax.f32 %v1678_v12, 0.0  ;;  %v1534_v42 = vadd.f32 1e-05, %v1470_v63  ;;  %v1655_v60 = vmul.f32 %v3360_v29, %v1619_v36  ;;  %v1603_v23 = vmul.f32 %v2259_v7, %v1507_v1 }
 0x39d   :  { %2268 = vrsqrt.f32 %v1552_v57  ;;  %v1391_v31 = vmul.f32 0.01, %v1345_v24  ;;  %1982 = vmatprep.subr.mxu0 %v1727_v46  ;;  %v2263_v0 = vpop.eup %2262  ;;  %v1725_v61 = vmax.f32 %v1693_v51, 0.0  ;;  %v1692_v4 = vadd.f32 %v3369_v32, %v1656_v43  ;;  %v3611_v24 = vld [vmem:[#allocation13_spill] sm:$0xff]  ;;  %v3612_v51 = vld [vmem:[#allocation8_spill] sm:$0xff] }
 0x39e   :  { %2270 = vrsqrt.f32 %v1536_v25  ;;  %v1618_v48 = vmul.f32 %v2261_v49, %v1522_v45  ;;  %v1506_v6 = vsub.f32 %v3608_v44, %v3431_v21  ;;  %v1709_v53 = vmax.f32 %v1677_v11, 0.0  ;;  %v3613_v45 = vld [vmem:[#allocation9_spill] sm:$0xff]  ;;  %v3615_v44 = vld [vmem:[#allocation10_spill] sm:$0xff] }
 0x39f   :  { %v1455_v5 = vsub.f32 %v1391_v31, %v1423_v35  ;;  %2272 = vrsqrt.f32 %v1535_v14  ;;  %v1676_v30 = vadd.f32 %v3369_v32, %v1640_v47  ;;  %v1521_v59 = vsub.f32 %v3609_v52, %v3452_v28  ;;  %v3610_v28 = vld [vmem:[#allocation7_spill] sm:$0xff] }
 0x3a0   :  { %v1215_v9 = vpop.xlane.xlu0 %1214  ;;  %1983 = vmatpush3.xpose.msra.mxu0 %v1711_v8  ;;  %v1691_v16 = vadd.f32 %v3369_v32, %v1655_v60  ;;  %v1639_v50 = vmul.f32 %v3360_v29, %v1603_v23  ;;  %v1602_v21 = vmul.f32 %v2263_v0, %v1506_v6  ;;  %v1724_v46 = vmax.f32 %v1692_v4, 0.0 }
 0x3a1   :  { %v1487_v3 = vmax.f32 %v1455_v5, 0.0  ;;  %v3522_v19 = vmul.f32 0.01, %v1215_v9  ;;  %1984 = vmatprep.subr.mxu0 %v1726_v33  ;;  %v1654_v27 = vmul.f32 %v3360_v29, %v1618_v48  ;;  %v1505_v2 = vsub.f32 %v3610_v28, %v3450_v62 }
 0x3a2   :  { %v2265_v18 = vpop.eup %2264  ;;  %v1520_v8 = vsub.f32 %v3611_v24, %v3477_v58  ;;  %v1708_v34 = vmax.f32 %v1676_v30, 0.0  ;;  %v1723_v31 = vmax.f32 %v1691_v16, 0.0  ;;  %v1675_v12 = vadd.f32 %v3369_v32, %v1639_v50 }
 0x3a3   :  { %v1551_v10 = vadd.f32 1e-05, %v1487_v3  ;;  %v1422_v56 = vmul.f32 %v3522_v19, %v3522_v19  ;;  %v2267_v15 = vpop.eup %2266  ;;  %v1617_v54 = vmul.f32 %v2265_v18, %v1521_v59  ;;  %v1638_v14 = vmul.f32 %v3360_v29, %v1602_v21 }
 0x3a4   :  { %v1343_v40 = vpop.xlane.xlu0 %1342  ;;  %1985 = vmatpush3.xpose.msra.mxu0 %v1710_v37  ;;  %v1601_v63 = vmul.f32 %v2267_v15, %v1505_v2  ;;  %v1690_v5 = vadd.f32 %v3369_v32, %v1654_v27  ;;  %v1504_v58 = vsub.f32 %v3612_v51, %v3460_v13  ;;  %v1707_v43 = vmax.f32 %v1675_v12, 0.0  ;;  %v3614_v13 = vld [vmem:[#allocation14_spill] sm:$0xff] }
 0x3a5   :  { %2274 = vrsqrt.f32 %v1551_v10  ;;  %v1390_v25 = vmul.f32 0.01, %v1343_v40  ;;  %1986 = vmatprep.subr.mxu0 %v1725_v61  ;;  %v1653_v62 = vmul.f32 %v3360_v29, %v1617_v54  ;;  %v1674_v49 = vadd.f32 %v3369_v32, %v1638_v14 }
 0x3a6   :  { %2276 = vrsqrt.f32 %v1534_v42  ;;  %v1637_v55 = vmul.f32 %v3360_v29, %v1601_v63  ;;  %v1722_v11 = vmax.f32 %v1690_v5, 0.0  ;;  %v1503_v3 = vsub.f32 %v3613_v45, %v3471_v26 }
 0x3a7   :  { %v1454_v57 = vsub.f32 %v1390_v25, %v1422_v56  ;;  %v1689_v47 = vadd.f32 %v3369_v32, %v1653_v62  ;;  %v1519_v37 = vsub.f32 %v3614_v13, %v3501_v20  ;;  %v1706_v42 = vmax.f32 %v1674_v49, 0.0  ;;  %v3616_v56 = vld [vmem:[#allocation15_spill] sm:$0xff] }
 0x3a8   :  { %1987 = vmatpush3.xpose.msra.mxu0 %v1709_v53  ;;  %v1673_v60 = vadd.f32 %v3369_v32, %v1637_v55  ;;  %v1502_v26 = vsub.f32 %v3615_v44, %v3484_v22  ;;  %v1518_v25 = vsub.f32 %v3616_v56, %v3522_v19  ;;  %v3617_v24 = vrot.slane %v3010_v38, 6 }
 0x3a9   :  { %v1486_v39 = vmax.f32 %v1454_v57, 0.0  ;;  %1988 = vmatprep.subr.mxu0 %v1724_v46  ;;  %v1721_v4 = vmax.f32 %v1689_v47, 0.0  ;;  %v3618_v5 = vlaneseq }
 0x3aa   :  { %v2269_v35 = vpop.eup %2268  ;;  %v1705_v6 = vmax.f32 %v1673_v60, 0.0 }
 0x3ab   :  { %v2271_v36 = vpop.eup %2270  ;;  %v1550_v7 = vadd.f32 1e-05, %v1486_v39  ;;  %v1616_v33 = vmul.f32 %v2269_v35, %v1520_v8  ;;  %v2304_v8 = vmov 1966171168   ;;  %vm1833_vm1 = vcmp.lt.s32.totalorder %v3618_v5, 256 }
 0x3ac   :  { %1989 = vmatpush3.xpose.msra.mxu0 %v1708_v34  ;;  %v1600_v1 = vmul.f32 %v2271_v36, %v1504_v58  ;;  %v2273_v9 = vpop.eup %2272  ;;  %v1817_v39 = vunpack.c.l.s4 %v2304_v8 }
 0x3ad   :  { %2278 = vrsqrt.f32 %v1550_v7  ;;  %1990 = vmatprep.subr.mxu0 %v1723_v31  ;;  %v1652_v17 = vmul.f32 %v3360_v29, %v1616_v33  ;;  %v1599_v10 = vmul.f32 %v2273_v9, %v1503_v3 }
 0x3ae   :  { %v1636_v23 = vmul.f32 %v3360_v29, %v1600_v1  ;;  %v1818_v31 = vunpack.c.0.s8 %v1817_v39 }
 0x3af   :  { %v1688_v48 = vadd.f32 %v3369_v32, %v1652_v17  ;;  %v1635_v53 = vmul.f32 %v3360_v29, %v1599_v10 }
 0x3b0   :  { %1991 = vmatpush3.xpose.msra.mxu0 %v1707_v43  ;;  %v1672_v40 = vadd.f32 %v3369_v32, %v1636_v23  ;;  %v1821_v36 = vsub.s32 %v1818_v31, %v2484_v41 }
 0x3b1   :  { %1992 = vmatprep.subr.mxu0 %v1722_v11  ;;  %v1720_v52 = vmax.f32 %v1688_v48, 0.0  ;;  %v1671_v50 = vadd.f32 %v3369_v32, %v1635_v53 }
 0x3b2   :  { %v2275_v0 = vpop.eup %2274  ;;  %v1704_v22 = vmax.f32 %v1672_v40, 0.0 }
 0x3b3   :  { %v2277_v61 = vpop.eup %2276  ;;  %v1615_v18 = vmul.f32 %v2275_v0, %v1519_v37  ;;  %v1703_v27 = vmax.f32 %v1671_v50, 0.0 }
 0x3b4   :  { %1993 = vmatpush3.xpose.msra.mxu0 %v1706_v42  ;;  %v1598_v30 = vmul.f32 %v2277_v61, %v1502_v26 }
 0x3b5   :  { %1994 = vmatprep.subr.mxu0 %v1721_v4  ;;  %v1651_v20 = vmul.f32 %v3360_v29, %v1615_v18 }
 0x3b6   :  { %v1634_v21 = vmul.f32 %v3360_v29, %v1598_v30 }
 0x3b7   :  { %v1687_v59 = vadd.f32 %v3369_v32, %v1651_v20 }
 0x3b8   :  { %1995 = vmatpush3.xpose.msra.mxu0 %v1705_v6  ;;  %v1670_v54 = vadd.f32 %v3369_v32, %v1634_v21 }
 0x3b9   :  { %1996 = vmatprep.subr.mxu0 %v1720_v52  ;;  %v1719_v15 = vmax.f32 %v1687_v59, 0.0 }
 0x3ba   :  { %v2279_v16 = vpop.eup %2278  ;;  %v1702_v2 = vmax.f32 %v1670_v54, 0.0  ;;  %v1737_v34 = vpop.permute.xlu0 %1736 }
 0x3bb   :  { %v1614_v57 = vmul.f32 %v2279_v16, %v1518_v25  ;;  %v1740_v35 = vrot.slane %v1737_v34, 7 }
 0x3bc   :  { %1997 = vmatpush3.xpose.msra.mxu0 %v1704_v22 }
 0x3bd   :  { %1998 = vmatprep.subr.mxu0 %v1719_v15  ;;  %v1650_v46 = vmul.f32 %v3360_v29, %v1614_v57 }
 0x3bf   :  { %v1686_v28 = vadd.f32 %v3369_v32, %v1650_v46 }
 0x3c0   :  { %1999 = vmatpush3.xpose.msra.mxu0 %v1703_v27 }
 0x3c1   :  { %v1718_v19 = vmax.f32 %v1686_v28, 0.0 }
 0x3c3   :  { %2000 = vmatprep.subr.mxu0 %v1718_v19 }
 0x3c4   :  { %2001 = vmatpush3.xpose.msra.mxu0 %v1702_v2 }
 0x3c7   :  { %2003 = vmatmul.mubr.f32.vlgmr.msra.gmra.mxu0 %v3617_v24 }
 0x487   :  { %v1808_v12 = vpop.f32.mrf.mxu0 }
 0x488   :  { %v1809_v14 = vadd.f32 %v1808_v12, %v1740_v35 }
 0x489   :  { %v1810_v29 = vpop.f32.mrf.mxu0 }
 0x48a   :  { %v1811_v63 = vadd.f32 %v1810_v29, %v1740_v35 }
 0x48c   :  { %v1815_v32 = vcombine.low %v1809_v14, %v1811_v63 }
 0x48e   :  { %v1822_v7 = vrot.slane %v1815_v32, %v1821_v36 }
 0x490   :  { %v1829_v62 = vrot.slane %v1822_v7, %v1821_v36 }
 0x492   :  { %1835 = vst.msk [vmem:[#allocation2] sm:$0x3] %vm1833_vm1, %v1829_v62 }
 0x493   :  { %2292 = shalt.err (!%p2289_p4)
}
 0x494   :  { %1845 = dma.vmem_to_hbm [thread:$0]  %s1843_s20, 32, %s3581_s4, [#allocation3]  }
 0x495   :  { %2301 = dma.done.wait [#allocation3], 32  }
 0x496   :  { %2302 = vsyncadd [#allocation3], 4294967264 }
 0x497   :  { %1849 = vsyncpa [#allocation3], 1 }

</bundles_post_ra>
